<compile_context>
chip_gen: v5e
topology: v5e:2x2
jax: 0.10.0
libtpu: 0.0.40
codegen_flags: <defaults>
</compile_context>

<pallas_src>
import functools

import jax
import jax.numpy as jnp
import numpy as np
from jax import lax
from jax.experimental import pallas as pl
from jax.experimental.pallas import tpu as pltpu

# Dimension-number shorthands for transposed contractions (handled natively by the MXU).
_TN = (((0,), (0,)), ((), ()))   # lhs^T @ rhs   (contract lhs dim 0 with rhs dim 0)
_NT = (((1,), (1,)), ((), ()))   # lhs @ rhs^T   (contract lhs dim 1 with rhs dim 1)


def _post_block(x_attn, x_in, wo, bo, g1, b1, wf1, bf1, wf2, bf2, g2, b2):
    """O linear -> residual -> BatchNorm1d -> FFN(ReLU) -> residual -> BatchNorm1d."""
    eps = 1e-5
    f32 = jnp.float32
    y = jnp.dot(x_attn, wo, preferred_element_type=f32) + bo
    y = x_in + y                                                  # residual 1
    mean = jnp.mean(y, axis=0, keepdims=True)                     # train-mode batch stats
    var = jnp.mean((y - mean) ** 2, axis=0, keepdims=True)
    y = (y - mean) * lax.rsqrt(var + eps) * g1 + b1
    y_in2 = y
    t = jnp.dot(y, wf1, preferred_element_type=f32) + bf1
    t = jnp.maximum(t, 0.0)                                       # ReLU
    t = jnp.dot(t, wf2, preferred_element_type=f32) + bf2
    y = y_in2 + t                                                 # residual 2
    mean2 = jnp.mean(y, axis=0, keepdims=True)
    var2 = jnp.mean((y - mean2) ** 2, axis=0, keepdims=True)
    return (y - mean2) * lax.rsqrt(var2 + eps) * g2 + b2


def _gt_layer_kernel(inv_scale, hd,
                     h_ref, e_ref, w_qkv_ref, w_e_ref,
                     src_oh_ref, dst_oh_ref, sum_mat_ref,
                     wo_h_ref, bo_h_ref, g1_h_ref, b1_h_ref,
                     wf1_h_ref, bf1_h_ref, wf2_h_ref, bf2_h_ref,
                     g2_h_ref, b2_h_ref,
                     wo_e_ref, bo_e_ref, g1_e_ref, b1_e_ref,
                     wf1_e_ref, bf1_e_ref, wf2_e_ref, bf2_e_ref,
                     g2_e_ref, b2_e_ref,
                     h_out_ref, e_out_ref):
    f32 = jnp.float32
    h = h_ref[...]                       # (N, in_dim)
    e = e_ref[...]                       # (E, in_dim)

    # Fused Q|K|V projection (one lane-dense matmul) + proj_e; no bias.
    qkv = jnp.dot(h, w_qkv_ref[...], preferred_element_type=f32)        # (N, 3*HD)
    pe = jnp.dot(e, w_e_ref[...], preferred_element_type=f32)           # (E, HD)

    src = src_oh_ref[...].astype(f32)    # (E, N) one-hot (exact in bf16)
    dst = dst_oh_ref[...].astype(f32)    # (E, N)

    q = qkv[:, :hd]                      # (N, HD)
    kv = qkv[:, hd:]                     # (N, 2*HD)   [K | V]

    # Gather node features onto edges via incidence matmuls (MXU).
    q_dst = jnp.dot(dst, q, preferred_element_type=f32)                 # (E, HD)
    kv_src = jnp.dot(src, kv, preferred_element_type=f32)               # (E, 2*HD)
    k_src = kv_src[:, :hd]
    v_src = kv_src[:, hd:]

    # score = K_src * Q_dst / sqrt(Dh) * proj_e   (this is the attention's e_out).
    score = (k_src * q_dst) * inv_scale * pe                            # (E, HD)

    # Per-head sum over head features, clamp to [-5,5], exp.
    sm = sum_mat_ref[...]                                               # (HD, H)
    s_sum = jnp.dot(score, sm, preferred_element_type=f32)              # (E, H)
    s_exp = jnp.exp(jnp.clip(s_sum, -5.0, 5.0))                         # (E, H)

    # Broadcast per-head weight back to per-feature lanes (contract head axis).
    s_b = lax.dot_general(s_exp, sm, _NT, preferred_element_type=f32)   # (E, HD)

    # Scatter-sum to destination nodes, contracting the edge axis directly against
    # dst_oh (no transposed copy shipped from the host).
    wv = lax.dot_general(dst, v_src * s_b, _TN, preferred_element_type=f32)  # (N, HD)
    z = lax.dot_general(dst, s_exp, _TN, preferred_element_type=f32)         # (N, H)
    inv_z = pl.reciprocal(z + 1e-6, approx=True)                             # EUP slot
    h_attn = wv * lax.dot_general(inv_z, sm, _NT, preferred_element_type=f32)  # (N, HD)

    # dropout = 0.0 -> identity.  Post blocks for both streams, fused (no HBM trip).
    h_out_ref[...] = _post_block(
        h_attn, h,
        wo_h_ref[...], bo_h_ref[...], g1_h_ref[...], b1_h_ref[...],
        wf1_h_ref[...], bf1_h_ref[...], wf2_h_ref[...], bf2_h_ref[...],
        g2_h_ref[...], b2_h_ref[...])
    e_out_ref[...] = _post_block(
        score, e,
        wo_e_ref[...], bo_e_ref[...], g1_e_ref[...], b1_e_ref[...],
        wf1_e_ref[...], bf1_e_ref[...], wf2_e_ref[...], bf2_e_ref[...],
        g2_e_ref[...], b2_e_ref[...])


def graph_transformer_layer(h, e, src_idx, dst_idx, params, num_heads):
    N, in_dim = h.shape
    E = e.shape[0]
    hd = params["attn"]["wq"].shape[1]           # H * Dh  (= out_dim)
    head_dim = hd // num_heads

    # bf16 incidence matrices: one-hot values are exact in bf16; halves HBM/VMEM.
    src_oh = jax.nn.one_hot(src_idx, N, dtype=jnp.bfloat16)             # (E, N)
    dst_oh = jax.nn.one_hot(dst_idx, N, dtype=jnp.bfloat16)             # (E, N)
    # (HD, H) block matrix: sums each head's Dh features / broadcasts per-head scalars.
    sum_mat = jnp.repeat(jnp.eye(num_heads, dtype=jnp.float32), head_dim, axis=0)
    # Fused Q|K|V weight: (in_dim, 3*HD).
    w_qkv = jnp.concatenate(
        [params["attn"]["wq"], params["attn"]["wk"], params["attn"]["wv"]], axis=1)

    ph, pe_ = params["h"], params["e"]
    h_stream = (ph["wo"], ph["bo"], ph["g1"], ph["b1"], ph["wf1"], ph["bf1"],
                ph["wf2"], ph["bf2"], ph["g2"], ph["b2"])
    e_stream = (pe_["wo"], pe_["bo"], pe_["g1"], pe_["b1"], pe_["wf1"], pe_["bf1"],
                pe_["wf2"], pe_["bf2"], pe_["g2"], pe_["b2"])
    operands = (h, e, w_qkv, params["attn"]["we"], src_oh, dst_oh, sum_mat) \
        + h_stream + e_stream

    # Advisory cost estimate for the XLA scheduler.
    flops = 2 * (N * in_dim * 3 * hd + E * in_dim * hd            # projections
                 + E * N * 3 * hd                                 # edge gathers
                 + 2 * E * hd * num_heads                         # head sum + broadcast
                 + E * N * (hd + num_heads)                       # scatter to nodes
                 + N * num_heads * hd                             # 1/z broadcast
                 + (N + E) * 5 * hd * hd)                         # O-proj + FFN (x2 hidden)
    transcendentals = E * num_heads + N * num_heads + 4 * hd
    bytes_accessed = sum(int(np.prod(a.shape)) * np.dtype(a.dtype).itemsize
                         for a in operands) + 4 * (N + E) * hd

    kernel = functools.partial(_gt_layer_kernel, float(1.0 / np.sqrt(head_dim)), hd)
    return pl.pallas_call(
        kernel,
        out_shape=(jax.ShapeDtypeStruct((N, hd), jnp.float32),
                   jax.ShapeDtypeStruct((E, hd), jnp.float32)),
        compiler_params=pltpu.CompilerParams(vmem_limit_bytes=32 * 1024 * 1024),
        cost_estimate=pl.CostEstimate(flops=int(flops),
                                      transcendentals=int(transcendentals),
                                      bytes_accessed=int(bytes_accessed)),
    )(*operands)


# ----------------------------------------------------------------------------
# Deterministic parameter construction.
# ----------------------------------------------------------------------------
def make_params(key, in_dim, out_dim):
    keys = jax.random.split(key, 16)

    def w(k, shape, scale=0.1):
        return (scale * jax.random.normal(k, shape)).astype(jnp.float32)

    def stream_params(ks):
        return {
            "wo": w(ks[0], (out_dim, out_dim)),
            "bo": w(ks[1], (1, out_dim), 0.05),
            "g1": jnp.ones((1, out_dim), jnp.float32),
            "b1": jnp.zeros((1, out_dim), jnp.float32),
            "wf1": w(ks[2], (out_dim, out_dim * 2)),
            "bf1": w(ks[3], (1, out_dim * 2), 0.05),
            "wf2": w(ks[4], (out_dim * 2, out_dim)),
            "bf2": w(ks[5], (1, out_dim), 0.05),
            "g2": jnp.ones((1, out_dim), jnp.float32),
            "b2": jnp.zeros((1, out_dim), jnp.float32),
        }

    return {
        "attn": {
            "wq": w(keys[0], (in_dim, out_dim)),
            "wk": w(keys[1], (in_dim, out_dim)),
            "wv": w(keys[2], (in_dim, out_dim)),
            "we": w(keys[3], (in_dim, out_dim)),
        },
        "h": stream_params(keys[4:10]),
        "e": stream_params(keys[10:16]),
    }


if __name__ == "__main__":
    key = jax.random.PRNGKey(0)
    k_h, k_e, k_src, k_dst, k_p = jax.random.split(key, 5)

    IN_DIM = 32           # residual requires in_dim == out_dim
    OUT_DIM = 32
    NUM_HEADS = 4
    N_NODES = 16
    N_EDGES = 48

    h = jax.random.normal(k_h, (N_NODES, IN_DIM), dtype=jnp.float32)
    e = jax.random.normal(k_e, (N_EDGES, IN_DIM), dtype=jnp.float32)
    src_idx = jax.random.randint(k_src, (N_EDGES,), 0, N_NODES)
    dst_idx = jax.random.randint(k_dst, (N_EDGES,), 0, N_NODES)

    params = make_params(k_p, IN_DIM, OUT_DIM)

    h_out, e_out = graph_transformer_layer(h, e, src_idx, dst_idx, params, NUM_HEADS)
    jax.block_until_ready((h_out, e_out))

    assert h_out.shape == (N_NODES, OUT_DIM)
    assert e_out.shape == (N_EDGES, OUT_DIM)
    assert bool(jnp.isfinite(h_out).all()) and bool(jnp.isfinite(e_out).all())
    print("KERNEL_OK")
</pallas_src>

<mosaic_0001>
module attributes {stable_mosaic.version = 11 : i64} {
  func.func @_gt_layer_kernel(%arg0: memref<16x32xf32, #tpu.memory_space<vmem>>, %arg1: memref<48x32xf32, #tpu.memory_space<vmem>>, %arg2: memref<32x96xf32, #tpu.memory_space<vmem>>, %arg3: memref<32x32xf32, #tpu.memory_space<vmem>>, %arg4: memref<48x16xbf16, #tpu.memory_space<vmem>>, %arg5: memref<48x16xbf16, #tpu.memory_space<vmem>>, %arg6: memref<32x4xf32, #tpu.memory_space<vmem>>, %arg7: memref<32x32xf32, #tpu.memory_space<vmem>>, %arg8: memref<1x32xf32, #tpu.memory_space<vmem>>, %arg9: memref<1x32xf32, #tpu.memory_space<vmem>>, %arg10: memref<1x32xf32, #tpu.memory_space<vmem>>, %arg11: memref<32x64xf32, #tpu.memory_space<vmem>>, %arg12: memref<1x64xf32, #tpu.memory_space<vmem>>, %arg13: memref<64x32xf32, #tpu.memory_space<vmem>>, %arg14: memref<1x32xf32, #tpu.memory_space<vmem>>, %arg15: memref<1x32xf32, #tpu.memory_space<vmem>>, %arg16: memref<1x32xf32, #tpu.memory_space<vmem>>, %arg17: memref<32x32xf32, #tpu.memory_space<vmem>>, %arg18: memref<1x32xf32, #tpu.memory_space<vmem>>, %arg19: memref<1x32xf32, #tpu.memory_space<vmem>>, %arg20: memref<1x32xf32, #tpu.memory_space<vmem>>, %arg21: memref<32x64xf32, #tpu.memory_space<vmem>>, %arg22: memref<1x64xf32, #tpu.memory_space<vmem>>, %arg23: memref<64x32xf32, #tpu.memory_space<vmem>>, %arg24: memref<1x32xf32, #tpu.memory_space<vmem>>, %arg25: memref<1x32xf32, #tpu.memory_space<vmem>>, %arg26: memref<1x32xf32, #tpu.memory_space<vmem>>, %arg27: memref<16x32xf32, #tpu.memory_space<vmem>>, %arg28: memref<48x32xf32, #tpu.memory_space<vmem>>) attributes {dimension_semantics = [], scalar_prefetch = 0 : i64, scratch_operands = 0 : i64, tpu.core_type = #tpu.core_type<tc>} {
    %c0 = arith.constant 0 : index
    %c0_0 = arith.constant 0 : index
    %0 = vector.load %arg0[%c0, %c0_0] : memref<16x32xf32, #tpu.memory_space<vmem>>, vector<16x32xf32>
    %c0_1 = arith.constant 0 : index
    %c0_2 = arith.constant 0 : index
    %1 = vector.load %arg1[%c0_1, %c0_2] : memref<48x32xf32, #tpu.memory_space<vmem>>, vector<48x32xf32>
    %c0_3 = arith.constant 0 : index
    %c0_4 = arith.constant 0 : index
    %2 = vector.load %arg2[%c0_3, %c0_4] : memref<32x96xf32, #tpu.memory_space<vmem>>, vector<32x96xf32>
    %cst = arith.constant dense<0.000000e+00> : vector<16x96xf32>
    %3 = tpu.matmul %0, %2, %cst {dimension_numbers = #tpu.dot_dimension_numbers<[1], [0], [0], [1], [0, 0, 1, 1], [], []>} : vector<16x32xf32>, vector<32x96xf32>, vector<16x96xf32> -> vector<16x96xf32>
    %c0_5 = arith.constant 0 : index
    %c0_6 = arith.constant 0 : index
    %4 = vector.load %arg3[%c0_5, %c0_6] : memref<32x32xf32, #tpu.memory_space<vmem>>, vector<32x32xf32>
    %cst_7 = arith.constant dense<0.000000e+00> : vector<48x32xf32>
    %5 = tpu.matmul %1, %4, %cst_7 {dimension_numbers = #tpu.dot_dimension_numbers<[1], [0], [0], [1], [0, 0, 1, 1], [], []>} : vector<48x32xf32>, vector<32x32xf32>, vector<48x32xf32> -> vector<48x32xf32>
    %c0_8 = arith.constant 0 : index
    %c0_9 = arith.constant 0 : index
    %6 = vector.load %arg4[%c0_8, %c0_9] : memref<48x16xbf16, #tpu.memory_space<vmem>>, vector<48x16xbf16>
    %7 = arith.extf %6 : vector<48x16xbf16> to vector<48x16xf32>
    %c0_10 = arith.constant 0 : index
    %c0_11 = arith.constant 0 : index
    %8 = vector.load %arg5[%c0_10, %c0_11] : memref<48x16xbf16, #tpu.memory_space<vmem>>, vector<48x16xbf16>
    %9 = arith.extf %8 : vector<48x16xbf16> to vector<48x16xf32>
    %10 = vector.extract_strided_slice %3 {offsets = [0, 0], sizes = [16, 32], strides = [1, 1]} : vector<16x96xf32> to vector<16x32xf32>
    %11 = vector.extract_strided_slice %3 {offsets = [0, 32], sizes = [16, 64], strides = [1, 1]} : vector<16x96xf32> to vector<16x64xf32>
    %cst_12 = arith.constant dense<0.000000e+00> : vector<48x32xf32>
    %12 = tpu.matmul %9, %10, %cst_12 {dimension_numbers = #tpu.dot_dimension_numbers<[1], [0], [0], [1], [0, 0, 1, 1], [], []>} : vector<48x16xf32>, vector<16x32xf32>, vector<48x32xf32> -> vector<48x32xf32>
    %cst_13 = arith.constant dense<0.000000e+00> : vector<48x64xf32>
    %13 = tpu.matmul %7, %11, %cst_13 {dimension_numbers = #tpu.dot_dimension_numbers<[1], [0], [0], [1], [0, 0, 1, 1], [], []>} : vector<48x16xf32>, vector<16x64xf32>, vector<48x64xf32> -> vector<48x64xf32>
    %14 = vector.extract_strided_slice %13 {offsets = [0, 0], sizes = [48, 32], strides = [1, 1]} : vector<48x64xf32> to vector<48x32xf32>
    %15 = vector.extract_strided_slice %13 {offsets = [0, 32], sizes = [48, 32], strides = [1, 1]} : vector<48x64xf32> to vector<48x32xf32>
    %16 = arith.mulf %14, %12 : vector<48x32xf32>
    %cst_14 = arith.constant 0.353553385 : f32
    %17 = vector.broadcast %cst_14 : f32 to vector<48x32xf32>
    %18 = arith.mulf %16, %17 : vector<48x32xf32>
    %19 = arith.mulf %18, %5 : vector<48x32xf32>
    %c0_15 = arith.constant 0 : index
    %c0_16 = arith.constant 0 : index
    %20 = vector.load %arg6[%c0_15, %c0_16] : memref<32x4xf32, #tpu.memory_space<vmem>>, vector<32x4xf32>
    %cst_17 = arith.constant dense<0.000000e+00> : vector<48x4xf32>
    %21 = tpu.matmul %19, %20, %cst_17 {dimension_numbers = #tpu.dot_dimension_numbers<[1], [0], [0], [1], [0, 0, 1, 1], [], []>} : vector<48x32xf32>, vector<32x4xf32>, vector<48x4xf32> -> vector<48x4xf32>
    %cst_18 = arith.constant -5.000000e+00 : f32
    %cst_19 = arith.constant 5.000000e+00 : f32
    %22 = vector.broadcast %cst_18 : f32 to vector<48x4xf32>
    %23 = arith.maximumf %22, %21 : vector<48x4xf32>
    %24 = vector.broadcast %cst_19 : f32 to vector<48x4xf32>
    %25 = arith.minimumf %24, %23 : vector<48x4xf32>
    %26 = math.exp %25 : vector<48x4xf32>
    %cst_20 = arith.constant dense<0.000000e+00> : vector<48x32xf32>
    %27 = tpu.matmul %26, %20, %cst_20 {dimension_numbers = #tpu.dot_dimension_numbers<[1], [1], [0], [0], [0, 0, 1, 0], [], []>} : vector<48x4xf32>, vector<32x4xf32>, vector<48x32xf32> -> vector<48x32xf32>
    %28 = arith.mulf %15, %27 : vector<48x32xf32>
    %cst_21 = arith.constant dense<0.000000e+00> : vector<16x32xf32>
    %29 = tpu.matmul %9, %28, %cst_21 {dimension_numbers = #tpu.dot_dimension_numbers<[0], [0], [1], [1], [0, 1, 1, 1], [], []>} : vector<48x16xf32>, vector<48x32xf32>, vector<16x32xf32> -> vector<16x32xf32>
    %cst_22 = arith.constant dense<0.000000e+00> : vector<16x4xf32>
    %30 = tpu.matmul %9, %26, %cst_22 {dimension_numbers = #tpu.dot_dimension_numbers<[0], [0], [1], [1], [0, 1, 1, 1], [], []>} : vector<48x16xf32>, vector<48x4xf32>, vector<16x4xf32> -> vector<16x4xf32>
    %cst_23 = arith.constant 9.99999997E-7 : f32
    %31 = vector.broadcast %cst_23 : f32 to vector<16x4xf32>
    %32 = arith.addf %30, %31 : vector<16x4xf32>
    %33 = tpu.reciprocal %32 {approx = true} : vector<16x4xf32> -> vector<16x4xf32>
    %cst_24 = arith.constant dense<0.000000e+00> : vector<16x32xf32>
    %34 = tpu.matmul %33, %20, %cst_24 {dimension_numbers = #tpu.dot_dimension_numbers<[1], [1], [0], [0], [0, 0, 1, 0], [], []>} : vector<16x4xf32>, vector<32x4xf32>, vector<16x32xf32> -> vector<16x32xf32>
    %35 = arith.mulf %29, %34 : vector<16x32xf32>
    %c0_25 = arith.constant 0 : index
    %c0_26 = arith.constant 0 : index
    %36 = vector.load %arg7[%c0_25, %c0_26] : memref<32x32xf32, #tpu.memory_space<vmem>>, vector<32x32xf32>
    %c0_27 = arith.constant 0 : index
    %c0_28 = arith.constant 0 : index
    %37 = vector.load %arg8[%c0_27, %c0_28] : memref<1x32xf32, #tpu.memory_space<vmem>>, vector<1x32xf32>
    %c0_29 = arith.constant 0 : index
    %c0_30 = arith.constant 0 : index
    %38 = vector.load %arg9[%c0_29, %c0_30] : memref<1x32xf32, #tpu.memory_space<vmem>>, vector<1x32xf32>
    %c0_31 = arith.constant 0 : index
    %c0_32 = arith.constant 0 : index
    %39 = vector.load %arg10[%c0_31, %c0_32] : memref<1x32xf32, #tpu.memory_space<vmem>>, vector<1x32xf32>
    %c0_33 = arith.constant 0 : index
    %c0_34 = arith.constant 0 : index
    %40 = vector.load %arg11[%c0_33, %c0_34] : memref<32x64xf32, #tpu.memory_space<vmem>>, vector<32x64xf32>
    %c0_35 = arith.constant 0 : index
    %c0_36 = arith.constant 0 : index
    %41 = vector.load %arg12[%c0_35, %c0_36] : memref<1x64xf32, #tpu.memory_space<vmem>>, vector<1x64xf32>
    %c0_37 = arith.constant 0 : index
    %c0_38 = arith.constant 0 : index
    %42 = vector.load %arg13[%c0_37, %c0_38] : memref<64x32xf32, #tpu.memory_space<vmem>>, vector<64x32xf32>
    %c0_39 = arith.constant 0 : index
    %c0_40 = arith.constant 0 : index
    %43 = vector.load %arg14[%c0_39, %c0_40] : memref<1x32xf32, #tpu.memory_space<vmem>>, vector<1x32xf32>
    %c0_41 = arith.constant 0 : index
    %c0_42 = arith.constant 0 : index
    %44 = vector.load %arg15[%c0_41, %c0_42] : memref<1x32xf32, #tpu.memory_space<vmem>>, vector<1x32xf32>
    %c0_43 = arith.constant 0 : index
    %c0_44 = arith.constant 0 : index
    %45 = vector.load %arg16[%c0_43, %c0_44] : memref<1x32xf32, #tpu.memory_space<vmem>>, vector<1x32xf32>
    %cst_45 = arith.constant dense<0.000000e+00> : vector<16x32xf32>
    %46 = tpu.matmul %35, %36, %cst_45 {dimension_numbers = #tpu.dot_dimension_numbers<[1], [0], [0], [1], [0, 0, 1, 1], [], []>} : vector<16x32xf32>, vector<32x32xf32>, vector<16x32xf32> -> vector<16x32xf32>
    %47 = vector.broadcast %37 : vector<1x32xf32> to vector<16x32xf32>
    %48 = arith.addf %46, %47 : vector<16x32xf32>
    %49 = arith.addf %0, %48 : vector<16x32xf32>
    %cst_46 = arith.constant dense<0.000000e+00> : vector<32xf32>
    %50 = vector.multi_reduction <add>, %49, %cst_46 [0] : vector<16x32xf32> to vector<32xf32>
    %51 = vector.shape_cast %50 : vector<32xf32> to vector<1x32xf32>
    %cst_47 = arith.constant 1.600000e+01 : f32
    %52 = vector.broadcast %cst_47 : f32 to vector<1x32xf32>
    %53 = arith.divf %51, %52 : vector<1x32xf32>
    %54 = vector.broadcast %53 : vector<1x32xf32> to vector<16x32xf32>
    %55 = arith.subf %49, %54 : vector<16x32xf32>
    %56 = arith.mulf %55, %55 : vector<16x32xf32>
    %cst_48 = arith.constant dense<0.000000e+00> : vector<32xf32>
    %57 = vector.multi_reduction <add>, %56, %cst_48 [0] : vector<16x32xf32> to vector<32xf32>
    %58 = vector.shape_cast %57 : vector<32xf32> to vector<1x32xf32>
    %cst_49 = arith.constant 1.600000e+01 : f32
    %59 = vector.broadcast %cst_49 : f32 to vector<1x32xf32>
    %60 = arith.divf %58, %59 : vector<1x32xf32>
    %61 = vector.broadcast %53 : vector<1x32xf32> to vector<16x32xf32>
    %62 = arith.subf %49, %61 : vector<16x32xf32>
    %cst_50 = arith.constant 9.99999974E-6 : f32
    %63 = vector.broadcast %cst_50 : f32 to vector<1x32xf32>
    %64 = arith.addf %60, %63 : vector<1x32xf32>
    %65 = math.rsqrt %64 : vector<1x32xf32>
    %66 = vector.broadcast %65 : vector<1x32xf32> to vector<16x32xf32>
    %67 = arith.mulf %62, %66 : vector<16x32xf32>
    %68 = vector.broadcast %38 : vector<1x32xf32> to vector<16x32xf32>
    %69 = arith.mulf %67, %68 : vector<16x32xf32>
    %70 = vector.broadcast %39 : vector<1x32xf32> to vector<16x32xf32>
    %71 = arith.addf %69, %70 : vector<16x32xf32>
    %cst_51 = arith.constant dense<0.000000e+00> : vector<16x64xf32>
    %72 = tpu.matmul %71, %40, %cst_51 {dimension_numbers = #tpu.dot_dimension_numbers<[1], [0], [0], [1], [0, 0, 1, 1], [], []>} : vector<16x32xf32>, vector<32x64xf32>, vector<16x64xf32> -> vector<16x64xf32>
    %73 = vector.broadcast %41 : vector<1x64xf32> to vector<16x64xf32>
    %74 = arith.addf %72, %73 : vector<16x64xf32>
    %cst_52 = arith.constant 0.000000e+00 : f32
    %75 = vector.broadcast %cst_52 : f32 to vector<16x64xf32>
    %76 = arith.maximumf %74, %75 : vector<16x64xf32>
    %cst_53 = arith.constant dense<0.000000e+00> : vector<16x32xf32>
    %77 = tpu.matmul %76, %42, %cst_53 {dimension_numbers = #tpu.dot_dimension_numbers<[1], [0], [0], [1], [0, 0, 1, 1], [], []>} : vector<16x64xf32>, vector<64x32xf32>, vector<16x32xf32> -> vector<16x32xf32>
    %78 = vector.broadcast %43 : vector<1x32xf32> to vector<16x32xf32>
    %79 = arith.addf %77, %78 : vector<16x32xf32>
    %80 = arith.addf %71, %79 : vector<16x32xf32>
    %cst_54 = arith.constant dense<0.000000e+00> : vector<32xf32>
    %81 = vector.multi_reduction <add>, %80, %cst_54 [0] : vector<16x32xf32> to vector<32xf32>
    %82 = vector.shape_cast %81 : vector<32xf32> to vector<1x32xf32>
    %cst_55 = arith.constant 1.600000e+01 : f32
    %83 = vector.broadcast %cst_55 : f32 to vector<1x32xf32>
    %84 = arith.divf %82, %83 : vector<1x32xf32>
    %85 = vector.broadcast %84 : vector<1x32xf32> to vector<16x32xf32>
    %86 = arith.subf %80, %85 : vector<16x32xf32>
    %87 = arith.mulf %86, %86 : vector<16x32xf32>
    %cst_56 = arith.constant dense<0.000000e+00> : vector<32xf32>
    %88 = vector.multi_reduction <add>, %87, %cst_56 [0] : vector<16x32xf32> to vector<32xf32>
    %89 = vector.shape_cast %88 : vector<32xf32> to vector<1x32xf32>
    %cst_57 = arith.constant 1.600000e+01 : f32
    %90 = vector.broadcast %cst_57 : f32 to vector<1x32xf32>
    %91 = arith.divf %89, %90 : vector<1x32xf32>
    %92 = vector.broadcast %84 : vector<1x32xf32> to vector<16x32xf32>
    %93 = arith.subf %80, %92 : vector<16x32xf32>
    %cst_58 = arith.constant 9.99999974E-6 : f32
    %94 = vector.broadcast %cst_58 : f32 to vector<1x32xf32>
    %95 = arith.addf %91, %94 : vector<1x32xf32>
    %96 = math.rsqrt %95 : vector<1x32xf32>
    %97 = vector.broadcast %96 : vector<1x32xf32> to vector<16x32xf32>
    %98 = arith.mulf %93, %97 : vector<16x32xf32>
    %99 = vector.broadcast %44 : vector<1x32xf32> to vector<16x32xf32>
    %100 = arith.mulf %98, %99 : vector<16x32xf32>
    %101 = vector.broadcast %45 : vector<1x32xf32> to vector<16x32xf32>
    %102 = arith.addf %100, %101 : vector<16x32xf32>
    %c0_59 = arith.constant 0 : index
    %c0_60 = arith.constant 0 : index
    %103 = vector.load %arg27[%c0_59, %c0_60] : memref<16x32xf32, #tpu.memory_space<vmem>>, vector<16x32xf32>
    tpu.vector_store %arg27[%c0_59, %c0_60], %102 {strides = array<i32>} : memref<16x32xf32, #tpu.memory_space<vmem>>, vector<16x32xf32>,
    %c0_61 = arith.constant 0 : index
    %c0_62 = arith.constant 0 : index
    %104 = vector.load %arg17[%c0_61, %c0_62] : memref<32x32xf32, #tpu.memory_space<vmem>>, vector<32x32xf32>
    %c0_63 = arith.constant 0 : index
    %c0_64 = arith.constant 0 : index
    %105 = vector.load %arg18[%c0_63, %c0_64] : memref<1x32xf32, #tpu.memory_space<vmem>>, vector<1x32xf32>
    %c0_65 = arith.constant 0 : index
    %c0_66 = arith.constant 0 : index
    %106 = vector.load %arg19[%c0_65, %c0_66] : memref<1x32xf32, #tpu.memory_space<vmem>>, vector<1x32xf32>
    %c0_67 = arith.constant 0 : index
    %c0_68 = arith.constant 0 : index
    %107 = vector.load %arg20[%c0_67, %c0_68] : memref<1x32xf32, #tpu.memory_space<vmem>>, vector<1x32xf32>
    %c0_69 = arith.constant 0 : index
    %c0_70 = arith.constant 0 : index
    %108 = vector.load %arg21[%c0_69, %c0_70] : memref<32x64xf32, #tpu.memory_space<vmem>>, vector<32x64xf32>
    %c0_71 = arith.constant 0 : index
    %c0_72 = arith.constant 0 : index
    %109 = vector.load %arg22[%c0_71, %c0_72] : memref<1x64xf32, #tpu.memory_space<vmem>>, vector<1x64xf32>
    %c0_73 = arith.constant 0 : index
    %c0_74 = arith.constant 0 : index
    %110 = vector.load %arg23[%c0_73, %c0_74] : memref<64x32xf32, #tpu.memory_space<vmem>>, vector<64x32xf32>
    %c0_75 = arith.constant 0 : index
    %c0_76 = arith.constant 0 : index
    %111 = vector.load %arg24[%c0_75, %c0_76] : memref<1x32xf32, #tpu.memory_space<vmem>>, vector<1x32xf32>
    %c0_77 = arith.constant 0 : index
    %c0_78 = arith.constant 0 : index
    %112 = vector.load %arg25[%c0_77, %c0_78] : memref<1x32xf32, #tpu.memory_space<vmem>>, vector<1x32xf32>
    %c0_79 = arith.constant 0 : index
    %c0_80 = arith.constant 0 : index
    %113 = vector.load %arg26[%c0_79, %c0_80] : memref<1x32xf32, #tpu.memory_space<vmem>>, vector<1x32xf32>
    %cst_81 = arith.constant dense<0.000000e+00> : vector<48x32xf32>
    %114 = tpu.matmul %19, %104, %cst_81 {dimension_numbers = #tpu.dot_dimension_numbers<[1], [0], [0], [1], [0, 0, 1, 1], [], []>} : vector<48x32xf32>, vector<32x32xf32>, vector<48x32xf32> -> vector<48x32xf32>
    %115 = vector.broadcast %105 : vector<1x32xf32> to vector<48x32xf32>
    %116 = arith.addf %114, %115 : vector<48x32xf32>
    %117 = arith.addf %1, %116 : vector<48x32xf32>
    %cst_82 = arith.constant dense<0.000000e+00> : vector<32xf32>
    %118 = vector.multi_reduction <add>, %117, %cst_82 [0] : vector<48x32xf32> to vector<32xf32>
    %119 = vector.shape_cast %118 : vector<32xf32> to vector<1x32xf32>
    %cst_83 = arith.constant 4.800000e+01 : f32
    %120 = vector.broadcast %cst_83 : f32 to vector<1x32xf32>
    %121 = arith.divf %119, %120 : vector<1x32xf32>
    %122 = vector.broadcast %121 : vector<1x32xf32> to vector<48x32xf32>
    %123 = arith.subf %117, %122 : vector<48x32xf32>
    %124 = arith.mulf %123, %123 : vector<48x32xf32>
    %cst_84 = arith.constant dense<0.000000e+00> : vector<32xf32>
    %125 = vector.multi_reduction <add>, %124, %cst_84 [0] : vector<48x32xf32> to vector<32xf32>
    %126 = vector.shape_cast %125 : vector<32xf32> to vector<1x32xf32>
    %cst_85 = arith.constant 4.800000e+01 : f32
    %127 = vector.broadcast %cst_85 : f32 to vector<1x32xf32>
    %128 = arith.divf %126, %127 : vector<1x32xf32>
    %129 = vector.broadcast %121 : vector<1x32xf32> to vector<48x32xf32>
    %130 = arith.subf %117, %129 : vector<48x32xf32>
    %cst_86 = arith.constant 9.99999974E-6 : f32
    %131 = vector.broadcast %cst_86 : f32 to vector<1x32xf32>
    %132 = arith.addf %128, %131 : vector<1x32xf32>
    %133 = math.rsqrt %132 : vector<1x32xf32>
    %134 = vector.broadcast %133 : vector<1x32xf32> to vector<48x32xf32>
    %135 = arith.mulf %130, %134 : vector<48x32xf32>
    %136 = vector.broadcast %106 : vector<1x32xf32> to vector<48x32xf32>
    %137 = arith.mulf %135, %136 : vector<48x32xf32>
    %138 = vector.broadcast %107 : vector<1x32xf32> to vector<48x32xf32>
    %139 = arith.addf %137, %138 : vector<48x32xf32>
    %cst_87 = arith.constant dense<0.000000e+00> : vector<48x64xf32>
    %140 = tpu.matmul %139, %108, %cst_87 {dimension_numbers = #tpu.dot_dimension_numbers<[1], [0], [0], [1], [0, 0, 1, 1], [], []>} : vector<48x32xf32>, vector<32x64xf32>, vector<48x64xf32> -> vector<48x64xf32>
    %141 = vector.broadcast %109 : vector<1x64xf32> to vector<48x64xf32>
    %142 = arith.addf %140, %141 : vector<48x64xf32>
    %cst_88 = arith.constant 0.000000e+00 : f32
    %143 = vector.broadcast %cst_88 : f32 to vector<48x64xf32>
    %144 = arith.maximumf %142, %143 : vector<48x64xf32>
    %cst_89 = arith.constant dense<0.000000e+00> : vector<48x32xf32>
    %145 = tpu.matmul %144, %110, %cst_89 {dimension_numbers = #tpu.dot_dimension_numbers<[1], [0], [0], [1], [0, 0, 1, 1], [], []>} : vector<48x64xf32>, vector<64x32xf32>, vector<48x32xf32> -> vector<48x32xf32>
    %146 = vector.broadcast %111 : vector<1x32xf32> to vector<48x32xf32>
    %147 = arith.addf %145, %146 : vector<48x32xf32>
    %148 = arith.addf %139, %147 : vector<48x32xf32>
    %cst_90 = arith.constant dense<0.000000e+00> : vector<32xf32>
    %149 = vector.multi_reduction <add>, %148, %cst_90 [0] : vector<48x32xf32> to vector<32xf32>
    %150 = vector.shape_cast %149 : vector<32xf32> to vector<1x32xf32>
    %cst_91 = arith.constant 4.800000e+01 : f32
    %151 = vector.broadcast %cst_91 : f32 to vector<1x32xf32>
    %152 = arith.divf %150, %151 : vector<1x32xf32>
    %153 = vector.broadcast %152 : vector<1x32xf32> to vector<48x32xf32>
    %154 = arith.subf %148, %153 : vector<48x32xf32>
    %155 = arith.mulf %154, %154 : vector<48x32xf32>
    %cst_92 = arith.constant dense<0.000000e+00> : vector<32xf32>
    %156 = vector.multi_reduction <add>, %155, %cst_92 [0] : vector<48x32xf32> to vector<32xf32>
    %157 = vector.shape_cast %156 : vector<32xf32> to vector<1x32xf32>
    %cst_93 = arith.constant 4.800000e+01 : f32
    %158 = vector.broadcast %cst_93 : f32 to vector<1x32xf32>
    %159 = arith.divf %157, %158 : vector<1x32xf32>
    %160 = vector.broadcast %152 : vector<1x32xf32> to vector<48x32xf32>
    %161 = arith.subf %148, %160 : vector<48x32xf32>
    %cst_94 = arith.constant 9.99999974E-6 : f32
    %162 = vector.broadcast %cst_94 : f32 to vector<1x32xf32>
    %163 = arith.addf %159, %162 : vector<1x32xf32>
    %164 = math.rsqrt %163 : vector<1x32xf32>
    %165 = vector.broadcast %164 : vector<1x32xf32> to vector<48x32xf32>
    %166 = arith.mulf %161, %165 : vector<48x32xf32>
    %167 = vector.broadcast %112 : vector<1x32xf32> to vector<48x32xf32>
    %168 = arith.mulf %166, %167 : vector<48x32xf32>
    %169 = vector.broadcast %113 : vector<1x32xf32> to vector<48x32xf32>
    %170 = arith.addf %168, %169 : vector<48x32xf32>
    %c0_95 = arith.constant 0 : index
    %c0_96 = arith.constant 0 : index
    %171 = vector.load %arg28[%c0_95, %c0_96] : memref<48x32xf32, #tpu.memory_space<vmem>>, vector<48x32xf32>
    tpu.vector_store %arg28[%c0_95, %c0_96], %170 {strides = array<i32>} : memref<48x32xf32, #tpu.memory_space<vmem>>, vector<48x32xf32>,
    return
  }
}

</mosaic_0001>

<bundles_post_ra>
// kernel: tpu_custom_call.1
= control target key start
LH: loop header
LB: loop body
LE: loop exit
PB: predicated region body
PF: predicated region fallthrough
CT: control target
= control target key end

     0   :  { %s2163_s0 = inlined_call_operand.vmem [shape: f32[16,32], index: 0, kind: input, shape index: {}]   ;;  %s2164_s1 = inlined_call_operand.vmem [shape: f32[48,32], index: 1, kind: input, shape index: {}]   ;;  %s2165_s2 = inlined_call_operand.vmem [shape: f32[32,96], index: 2, kind: input, shape index: {}]   ;;  %s2166_s3 = inlined_call_operand.vmem [shape: f32[32,32], index: 3, kind: input, shape index: {}]   ;;  %s2167_s4 = inlined_call_operand.vmem [shape: bf16[48,16], index: 4, kind: input, shape index: {}]   ;;  %s2168_s5 = inlined_call_operand.vmem [shape: bf16[48,16], index: 5, kind: input, shape index: {}]   ;;  %s2169_s6 = inlined_call_operand.vmem [shape: f32[32,4], index: 6, kind: input, shape index: {}]   ;;  %s2170_s7 = inlined_call_operand.vmem [shape: f32[32,32], index: 7, kind: input, shape index: {}]   ;;  %s2171_s8 = inlined_call_operand.vmem [shape: f32[1,32], index: 8, kind: input, shape index: {}]   ;;  %s2172_s9 = inlined_call_operand.vmem [shape: f32[1,32], index: 9, kind: input, shape index: {}]   ;;  %s2173_s10 = inlined_call_operand.vmem [shape: f32[1,32], index: 10, kind: input, shape index: {}]   ;;  %s2174_s11 = inlined_call_operand.vmem [shape: f32[32,64], index: 11, kind: input, shape index: {}]   ;;  %s2175_s12 = inlined_call_operand.vmem [shape: f32[1,64], index: 12, kind: input, shape index: {}]   ;;  %s2176_s13 = inlined_call_operand.vmem [shape: f32[64,32], index: 13, kind: input, shape index: {}]   ;;  %s2177_s14 = inlined_call_operand.vmem [shape: f32[1,32], index: 14, kind: input, shape index: {}]   ;;  %s2178_s15 = inlined_call_operand.vmem [shape: f32[1,32], index: 15, kind: input, shape index: {}]   ;;  %s2179_s16 = inlined_call_operand.vmem [shape: f32[1,32], index: 16, kind: input, shape index: {}]   ;;  %s2180_s17 = inlined_call_operand.vmem [shape: f32[32,32], index: 17, kind: input, shape index: {}]   ;;  %s2181_s18 = inlined_call_operand.vmem [shape: f32[1,32], index: 18, kind: input, shape index: {}]   ;;  %s2182_s19 = inlined_call_operand.vmem [shape: f32[1,32], index: 19, kind: input, shape index: {}]   ;;  %s2183_s20 = inlined_call_operand.vmem [shape: f32[1,32], index: 20, kind: input, shape index: {}]   ;;  %s2184_s21 = inlined_call_operand.vmem [shape: f32[32,64], index: 21, kind: input, shape index: {}]   ;;  %s2185_s22 = inlined_call_operand.vmem [shape: f32[1,64], index: 22, kind: input, shape index: {}]   ;;  %s2186_s23 = inlined_call_operand.vmem [shape: f32[64,32], index: 23, kind: input, shape index: {}]   ;;  %s2187_s24 = inlined_call_operand.vmem [shape: f32[1,32], index: 24, kind: input, shape index: {}]   ;;  %s2188_s25 = inlined_call_operand.vmem [shape: f32[1,32], index: 25, kind: input, shape index: {}]   ;;  %s2189_s26 = inlined_call_operand.vmem [shape: f32[1,32], index: 26, kind: input, shape index: {}]   ;;  %s2190_s27 = inlined_call_operand.hbm [shape: f32[16,32], index: 27, kind: output, shape index: {0}]   ;;  %s2191_s28 = inlined_call_operand.vmem [shape: f32[48,32], index: 28, kind: output, shape index: {1}]  }
   0x1   :  { %2201 = sst [smem:[#allocation5_spill]] %s2163_s0 }
   0x2   :  { %2202 = sst [smem:[#allocation6_spill]] %s2164_s1 }
   0x3   :  { %2203 = sst [smem:[#allocation7_spill]] %s2165_s2 }
   0x4   :  { %2204 = sst [smem:[#allocation8_spill]] %s2166_s3 }
   0x5   :  { %2205 = sst [smem:[#allocation9_spill]] %s2167_s4 }
   0x6   :  { %2206 = sst [smem:[#allocation10_spill]] %s2168_s5 }
   0x7   :  { %2207 = sst [smem:[#allocation11_spill]] %s2169_s6 }
   0x8   :  { %2208 = sst [smem:[#allocation12_spill]] %s2170_s7 }
   0x9   :  { %2209 = sst [smem:[#allocation13_spill]] %s2171_s8 }
   0xa   :  { %2210 = sst [smem:[#allocation14_spill]] %s2172_s9 }
   0xb   :  { %2211 = sst [smem:[#allocation15_spill]] %s2173_s10 }
   0xc   :  { %2212 = sst [smem:[#allocation16_spill]] %s2174_s11 }
   0xd   :  { %2213 = sst [smem:[#allocation17_spill]] %s2175_s12 }
   0xe   :  { %s2214_s9 = sld [smem:[#allocation7_spill]]  ;;  %vm101_vm0 = vcmask 261120  }
   0xf   :  { %s2215_s7 = sld [smem:[#allocation5_spill]] }
  0x14   :  { %v100_v0 = vld [vmem:[%s2214_s9 + $0x18] sm:$0xff]  ;;  %v99_v1 = vld [vmem:[%s2214_s9 + $0x10] sm:$0xff]  ;;  %v98_v2 = vld [vmem:[%s2214_s9 + $0x8] sm:$0xff] }
  0x15   :  { %1389 = vmatpush.msra.mxu2 %v100_v0  ;;  %120 = vmatpush.msra.mxu0 %v100_v0  ;;  %v97_v3 = vld [vmem:[%s2214_s9] sm:$0xff]  ;;  %v1658_v4 = vld [vmem:[%s2215_s7 + $0x8] sm:$0xff] }
  0x16   :  { %v1663_v5 = vld [vmem:[%s2215_s7] sm:$0xff] }
  0x17   :  { %1390 = vmatpush.msra.mxu2 %v99_v1  ;;  %121 = vmatpush.msra.mxu0 %v99_v1 }
  0x19   :  { %1391 = vmatpush.msra.mxu2 %v98_v2  ;;  %122 = vmatpush.msra.mxu0 %v98_v2 }
  0x1a   :  { %34 = vsyncpa [#allocation3], 0  ;;  %s2216_s5 = sld [smem:[#allocation10_spill]]  ;;  %vm212_vm1 = vcmask 130048   ;;  %s1491_s9 = smov 96   ;;  %vm426_vm2 = vcmask 31744  }
  0x1b   :  { %1392 = vmatpush.msra.mxu2 %v97_v3  ;;  %123 = vmatpush.msra.mxu0 %v97_v3  ;;  %s2217_s29 = sld [smem:[#allocation8_spill]]  ;;  %s1492_s30 = smov 32   ;;  %vm578_vm3 = vcmask 392192   ;;  %vm812_vm12 = vcmask 523264  }
  0x1c   :  { %1286 = vmatmul.msk.f32.vlgmr.msra.gmra.mxu2 %vm101_vm0, %v1658_v4  ;;  %1285 = vmatmul.msk.f32.vlgmr.msra.gmra.mxu0 %vm101_vm0, %v1663_v5  ;;  %s2218_s3 = sld [smem:[#allocation6_spill]] }
  0x1d   :  { %s2219_s7 = sld [smem:[#allocation9_spill]] }
  0x1e   :  { %s2220_s2 = sld [smem:[#allocation11_spill]] }
  0x1f   :  { %s2221_s10 = sld [smem:[#allocation12_spill]] }
  0x20   :  { %v1387_v7 = vld [vmem:[%s2216_s5 + $0x8] sm:$0xff]   ;;  %v1388_v12 = vld [vmem:[%s2216_s5 + $0x10] sm:$0xff]   ;;  %v1374_v15 = vld [vmem:[%s2216_s5] sm:$0xff]   ;;  %s2222_s0 = sld [smem:[#allocation13_spill]] }
  0x21   :  { %v1379_v10 = vunpack.c.l.bf16 %v1387_v7  ;;  %v1380_v11 = vunpack.c.h.bf16 %v1387_v7  ;;  %v1383_v13 = vunpack.c.l.bf16 %v1388_v12  ;;  %v1384_v14 = vunpack.c.h.bf16 %v1388_v12  ;;  %v134_v17 = vld [vmem:[%s2217_s29 + $0x18] sm:$0xff]  ;;  %v133_v18 = vld [vmem:[%s2217_s29 + $0x10] sm:$0xff]  ;;  %v132_v19 = vld [vmem:[%s2217_s29 + $0x8] sm:$0xff]  ;;  %s2224_s6 = sld [smem:[#allocation14_spill]] }
  0x22   :  { %v1375_v16 = vunpack.c.l.bf16 %v1374_v15  ;;  %165 = vmatpush.msra.mxu1 %v134_v17  ;;  %v1376_v20 = vunpack.c.h.bf16 %v1374_v15  ;;  %v131_v21 = vld [vmem:[%s2217_s29] sm:$0xff]  ;;  %v1707_v23 = vld [vmem:[%s2218_s3 + $0x8] sm:$0xff]  ;;  %v1714_v24 = vld [vmem:[%s2218_s3 + $0x10] sm:$0xff]  ;;  %s2223_s29 = sld [smem:[#allocation16_spill]] }
  0x23   :  { %v1699_v22 = vld [vmem:[%s2218_s3] sm:$0xff]  ;;  %v1725_v30 = vld [vmem:[%s2218_s3 + $0x18] sm:$0xff]  ;;  %v1385_v33 = vld [vmem:[%s2219_s7 + $0x8] sm:$0xff]  }
  0x24   :  { %166 = vmatpush.msra.mxu1 %v133_v18  ;;  %v1362_v25 = vld [vmem:[%s2219_s7] sm:$0xff]   ;;  %v1367_v34 = vunpack.c.l.bf16 %v1385_v33  ;;  %v1743_v35 = vld [vmem:[%s2218_s3 + $0x28] sm:$0xff]  ;;  %v1368_v36 = vunpack.c.h.bf16 %v1385_v33  ;;  %v1386_v37 = vld [vmem:[%s2219_s7 + $0x10] sm:$0xff]  }
  0x25   :  { %v1363_v28 = vunpack.c.l.bf16 %v1362_v25  ;;  %v1364_v31 = vunpack.c.h.bf16 %v1362_v25  ;;  %v1733_v32 = vld [vmem:[%s2218_s3 + $0x20] sm:$0xff]  ;;  %v1371_v38 = vunpack.c.l.bf16 %v1386_v37  ;;  %v1372_v39 = vunpack.c.h.bf16 %v1386_v37  ;;  %v1757_v41 = vld [vmem:[%s2220_s2 + $0x18] sm:$0xff]  ;;  %v1763_v43 = vld [vmem:[%s2220_s2 + $0x10] sm:$0xff] }
  0x26   :  { %167 = vmatpush.msra.mxu1 %v132_v19  ;;  %379 = vmatpush.msrb.mxu0 %v1757_v41  ;;  %v1769_v44 = vld [vmem:[%s2220_s2 + $0x8] sm:$0xff]  ;;  %v1775_v45 = vld [vmem:[%s2220_s2] sm:$0xff] }
  0x28   :  { %168 = vmatpush.msra.mxu1 %v131_v21  ;;  %380 = vmatpush.msrb.mxu0 %v1763_v43 }
  0x29   :  { %1287 = vmatmul.msk.f32.vlgmr.msra.gmra.mxu1 %vm101_vm0, %v1699_v22 }
  0x2a   :  { %381 = vmatpush.msrb.mxu0 %v1769_v44 }
  0x2c   :  { %382 = vmatpush.msrb.mxu0 %v1775_v45 }
  0x31   :  { %1288 = vmatmul.msk.f32.gmra.mxu1 %vm101_vm0, %v1707_v23 }
  0x39   :  { %1289 = vmatmul.msk.f32.gmra.mxu1 %vm101_vm0, %v1714_v24 }
  0x41   :  { %1290 = vmatmul.msk.f32.gmra.mxu1 %vm101_vm0, %v1725_v30 }
  0x49   :  { %1291 = vmatmul.msk.f32.gmra.mxu1 %vm101_vm0, %v1733_v32 }
  0x51   :  { %1292 = vmatmul.msk.f32.gmra.mxu1 %vm101_vm0, %v1743_v35 }
  0x99   :  { %v125_v6 = vpop.f32.mrf.mxu0 }
  0x9f   :  { %v128_v8 = vpop.f32.mrf.mxu2 }
  0xa0   :  { %245 = vmatpush.msrb.mxu2 %v128_v8  ;;  %1393 = vmatpush.msra.mxu3 %v128_v8  ;;  %v1403_v9 = vpack.i.bf16 %v125_v6, %v128_v8 }
  0xa2   :  { %1404 = vrot.lane.b32.xlu0 %v1403_v9, %s1491_s9  ;;  %246 = vmatpush.msrb.mxu2 %v125_v6 }
  0xa3   :  { %1394 = vmatpush.msra.mxu3 %v125_v6  ;;  %1293 = vmatmul.msk.f32.vlgmr.msrb.gmra.mxu2 %vm212_vm1, %v1375_v16 }
  0xa4   :  { %1295 = vmatmul.msk.f32.vlgmr.msra.gmra.mxu3 %vm212_vm1, %v1379_v10  ;;  %1317 = vmatpush.xpose.msk.msra.mxu2 %vm426_vm2, %v1757_v41 }
  0xa6   :  { %v170_v48 = vpop.f32.mrf.mxu1 }
  0xa8   :  { %1318 = vmatpush.xpose.msk.msra.mxu2 %vm426_vm2, %v1763_v43 }
  0xab   :  { %1294 = vmatmul.msk.f32.gmra.mxu2 %vm212_vm1, %v1376_v20 }
  0xac   :  { %1296 = vmatmul.msk.f32.gmra.mxu3 %vm212_vm1, %v1380_v11  ;;  %1319 = vmatpush.xpose.msk.msra.mxu2 %vm426_vm2, %v1769_v44 }
  0xae   :  { %v173_v52 = vpop.f32.mrf.mxu1 }
  0xb0   :  { %1320 = vmatpush.xpose.msk.msra.mxu2 %vm426_vm2, %v1775_v45 }
  0xb4   :  { %1297 = vmatmul.msk.f32.gmra.mxu3 %vm212_vm1, %v1383_v13 }
  0xb6   :  { %v176_v59 = vpop.f32.mrf.mxu1 }
  0xbc   :  { %1298 = vmatmul.msk.f32.gmra.mxu3 %vm212_vm1, %v1384_v14 }
  0xbe   :  { %v179_v1 = vpop.f32.mrf.mxu1 }
  0xc4   :  { %522 = vxpose.xlu0.b32.start [1/6] (short) (narrow) %v1375_v16, 16 }
  0xc6   :  { %v182_v9 = vpop.f32.mrf.mxu1 }
  0xcc   :  { %523 = vxpose.xlu0.b32.cont [2/6] (short) (narrow) %v1376_v20, 16 }
  0xce   :  { %v185_v15 = vpop.f32.mrf.mxu1 }
  0xd4   :  { %524 = vxpose.xlu0.b32.cont [3/6] (short) (narrow) %v1379_v10, 16 }
  0xdc   :  { %525 = vxpose.xlu0.b32.cont [4/6] (short) (narrow) %v1380_v11, 16 }
  0xe4   :  { %526 = vxpose.xlu0.b32.cont [5/6] (short) (narrow) %v1383_v13, 16 }
  0xec   :  { %527 = vxpose.xlu0.b32.end [6/6] (short) (narrow) %v1384_v14, 16 }
 0x114   :  { %v1405_v26 = vpop.permute.xlu0 %1404 }
 0x115   :  { %v1406_v27 = vunpack.i.l.bf16 %v1405_v26  ;;  %v1407_v29 = vunpack.i.h.bf16 %v1405_v26 }
 0x117   :  { %306 = vmatpush.msrb.mxu3 %v1406_v27 }
 0x119   :  { %307 = vmatpush.msrb.mxu3 %v1407_v29 }
 0x11a   :  { %1299 = vmatmul.msk.f32.vlgmr.msrb.gmra.mxu3 %vm212_vm1, %v1363_v28 }
 0x122   :  { %1300 = vmatmul.msk.f32.gmra.mxu3 %vm212_vm1, %v1364_v31 }
 0x126   :  { %v248_v49 = vpop.f32.mrf.mxu2 }
 0x127   :  { %v254_v40 = vpop.f32.mrf.mxu3 }
 0x12a   :  { %1301 = vmatmul.msk.f32.gmra.mxu3 %vm212_vm1, %v1367_v34 }
 0x12e   :  { %v251_v55 = vpop.f32.mrf.mxu2 }
 0x12f   :  { %v257_v42 = vpop.f32.mrf.mxu3 }
 0x132   :  { %1302 = vmatmul.msk.f32.gmra.mxu3 %vm212_vm1, %v1368_v36 }
 0x137   :  { %v260_v46 = vpop.f32.mrf.mxu3 }
 0x13a   :  { %1303 = vmatmul.msk.f32.gmra.mxu3 %vm212_vm1, %v1371_v38 }
 0x13f   :  { %v263_v47 = vpop.f32.mrf.mxu3 }
 0x142   :  { %1304 = vmatmul.msk.f32.gmra.mxu3 %vm212_vm1, %v1372_v39 }
 0x19d   :  { %v1778_v50 = vpop.f32.mrf.mxu3 }
 0x19e   :  { %v327_v51 = vmul.f32 %v1778_v50, %v248_v49 }
 0x1a0   :  { %v333_v53 = vmul.f32 0.35355338, %v327_v51 }
 0x1a2   :  { %v1781_v54 = vmul.f32 %v333_v53, %v170_v48 }
 0x1a4   :  { %1305 = vmatmul.msk.f32.vlgmr.msrb.gmra.mxu0 %vm101_vm0, %v1781_v54 }
 0x1a5   :  { %v1785_v56 = vpop.f32.mrf.mxu3 }
 0x1a6   :  { %v328_v57 = vmul.f32 %v1785_v56, %v251_v55 }
 0x1a8   :  { %v334_v58 = vmul.f32 0.35355338, %v328_v57 }
 0x1aa   :  { %v1788_v60 = vmul.f32 %v334_v58, %v173_v52 }
 0x1ac   :  { %1306 = vmatmul.msk.f32.gmra.mxu0 %vm101_vm0, %v1788_v60 }
 0x1ad   :  { %v1792_v61 = vpop.f32.mrf.mxu3 }
 0x1ae   :  { %v329_v62 = vmul.f32 %v1792_v61, %v254_v40 }
 0x1b0   :  { %v335_v63 = vmul.f32 0.35355338, %v329_v62 }
 0x1b2   :  { %v1799_v0 = vmul.f32 %v335_v63, %v176_v59 }
 0x1b4   :  { %1307 = vmatmul.msk.f32.gmra.mxu0 %vm101_vm0, %v1799_v0 }
 0x1b5   :  { %v1803_v2 = vpop.f32.mrf.mxu3 }
 0x1b6   :  { %v330_v3 = vmul.f32 %v1803_v2, %v257_v42 }
 0x1b8   :  { %v336_v6 = vmul.f32 0.35355338, %v330_v3 }
 0x1ba   :  { %v1810_v7 = vmul.f32 %v336_v6, %v179_v1 }
 0x1bc   :  { %1308 = vmatmul.msk.f32.gmra.mxu0 %vm101_vm0, %v1810_v7 }
 0x1bd   :  { %v1814_v8 = vpop.f32.mrf.mxu3 }
 0x1be   :  { %v331_v10 = vmul.f32 %v1814_v8, %v260_v46 }
 0x1c0   :  { %v337_v11 = vmul.f32 0.35355338, %v331_v10  ;;  %v538_v10 = vpop.trf.xlu0 }
 0x1c2   :  { %v1817_v12 = vmul.f32 %v337_v11, %v182_v9 }
 0x1c4   :  { %1309 = vmatmul.msk.f32.gmra.mxu0 %vm101_vm0, %v1817_v12 }
 0x1c5   :  { %v1821_v13 = vpop.f32.mrf.mxu3 }
 0x1c6   :  { %v332_v14 = vmul.f32 %v1821_v13, %v263_v47 }
 0x1c8   :  { %v338_v16 = vmul.f32 0.35355338, %v332_v14  ;;  %v539_v11 = vpop.trf.xlu0 }
 0x1ca   :  { %v1824_v17 = vmul.f32 %v338_v16, %v185_v15 }
 0x1cc   :  { %1310 = vmatmul.msk.f32.gmra.mxu0 %vm101_vm0, %v1824_v17 }
 0x221   :  { %v384_v18 = vpop.f32.mrf.mxu0 }
 0x222   :  { %v1311_v19 = vclamps-f32 %v384_v18, 5.0 }
 0x224   :  { %v414_v20 = vmul.f32 1.442695, %v1311_v19 }
 0x226   :  { %1437 = vpow2.f32 %v414_v20 }
 0x229   :  { %v387_v21 = vpop.f32.mrf.mxu0 }
 0x22a   :  { %v1312_v25 = vclamps-f32 %v387_v21, 5.0 }
 0x22c   :  { %v1438_v26 = vpop.eup %1437  ;;  %v416_v27 = vmul.f32 1.442695, %v1312_v25 }
 0x22d   :  { %1321 = vmatmul.msk.f32.vlgmr.msra.gmra.mxu2 %vm426_vm2, %v1438_v26 }
 0x22e   :  { %1439 = vpow2.f32 %v416_v27 }
 0x231   :  { %v390_v28 = vpop.f32.mrf.mxu0 }
 0x232   :  { %v1313_v29 = vclamps-f32 %v390_v28, 5.0 }
 0x234   :  { %v1440_v31 = vpop.eup %1439  ;;  %v418_v33 = vmul.f32 1.442695, %v1313_v29 }
 0x235   :  { %1322 = vmatmul.msk.f32.gmra.mxu2 %vm426_vm2, %v1440_v31 }
 0x236   :  { %1441 = vpow2.f32 %v418_v33 }
 0x239   :  { %v393_v34 = vpop.f32.mrf.mxu0 }
 0x23a   :  { %v1314_v36 = vclamps-f32 %v393_v34, 5.0 }
 0x23c   :  { %v1442_v37 = vpop.eup %1441  ;;  %v420_v38 = vmul.f32 1.442695, %v1314_v36 }
 0x23d   :  { %1323 = vmatmul.msk.f32.gmra.mxu2 %vm426_vm2, %v1442_v37 }
 0x23e   :  { %1443 = vpow2.f32 %v420_v38 }
 0x241   :  { %v396_v39 = vpop.f32.mrf.mxu0 }
 0x242   :  { %v1315_v40 = vclamps-f32 %v396_v39, 5.0  ;;  %v666_v39 = vld [vmem:[%s2221_s10 + $0x10] sm:$0xff] }
 0x244   :  { %v1444_v42 = vpop.eup %1443  ;;  %v422_v46 = vmul.f32 1.442695, %v1315_v40  ;;  %v896_v40 = vld [vmem:[%s2180_s17 + $0x18] sm:$0xff] }
 0x245   :  { %1324 = vmatmul.msk.f32.gmra.mxu2 %vm426_vm2, %v1444_v42 }
 0x246   :  { %1445 = vpow2.f32 %v422_v46  ;;  %v894_v46 = vld [vmem:[%s2180_s17 + $0x8] sm:$0xff] }
 0x249   :  { %v399_v47 = vpop.f32.mrf.mxu0 }
 0x24a   :  { %v1316_v48 = vclamps-f32 %v399_v47, 5.0  ;;  %v893_v47 = vld [vmem:[%s2180_s17] sm:$0xff] }
 0x24c   :  { %v1446_v49 = vpop.eup %1445  ;;  %v424_v51 = vmul.f32 1.442695, %v1316_v48 }
 0x24d   :  { %1325 = vmatmul.msk.f32.gmra.mxu2 %vm426_vm2, %v1446_v49 }
 0x24e   :  { %1447 = vpow2.f32 %v424_v51 }
 0x254   :  { %v1448_v52 = vpop.eup %1447 }
 0x255   :  { %1326 = vmatmul.msk.f32.gmra.mxu2 %vm426_vm2, %v1448_v52  ;;  %618 = vmatpush.msrb.mxu1 %v1448_v52 }
 0x257   :  { %619 = vmatpush.msrb.mxu1 %v1446_v49 }
 0x259   :  { %620 = vmatpush.msrb.mxu1 %v1444_v42  ;;  %v895_v42 = vld [vmem:[%s2180_s17 + $0x10] sm:$0xff] }
 0x25b   :  { %621 = vmatpush.msrb.mxu1 %v1442_v37 }
 0x25d   :  { %622 = vmatpush.msrb.mxu1 %v1440_v31 }
 0x25f   :  { %623 = vmatpush.msrb.mxu1 %v1438_v26 }
 0x260   :  { %1329 = vmatmul.msk.f32.vlgmr.msrb.gmra.mxu1 %vm578_vm3, %v538_v10 }
 0x268   :  { %1330 = vmatmul.msk.f32.gmra.mxu1 %vm578_vm3, %v539_v11 }
 0x2b0   :  { %v474_v53 = vpop.f32.mrf.mxu2 }
 0x2b8   :  { %v477_v55 = vpop.f32.mrf.mxu2 }
 0x2c0   :  { %v480_v57 = vpop.f32.mrf.mxu2 }
 0x2c1   :  { %502 = vrot.lane.b32.xlu2 %v480_v57, %s1492_s30 }
 0x2c8   :  { %v483_v58 = vpop.f32.mrf.mxu2 }
 0x2c9   :  { %504 = vrot.lane.b32.xlu2 %v483_v58, %s1492_s30  ;;  %v1493_v58 = vmov 16.0  }
 0x2d0   :  { %v486_v59 = vpop.f32.mrf.mxu2 }
 0x2d1   :  { %498 = vrot.lane.b32.xlu2 %v474_v53, %s1492_s30  ;;  %506 = vrot.lane.b32.xlu1 %v486_v59, %s1492_s30 }
 0x2d8   :  { %v489_v62 = vpop.f32.mrf.mxu2 }
 0x2d9   :  { %508 = vrot.lane.b32.xlu1 %v489_v62, %s1492_s30 }
 0x2e1   :  { %500 = vrot.lane.b32.xlu1 %v477_v55, %s1492_s30  ;;  %s1495_s30 = smov [#allocation2]  }
 0x31b   :  { %v503_v63 = vpop.permute.xlu2 %502 }
 0x31c   :  { %v518_v3 = vmul.f32 %v503_v63, %v1792_v61 }
 0x323   :  { %v505_v1 = vpop.permute.xlu2 %504 }
 0x324   :  { %v519_v6 = vmul.f32 %v505_v1, %v1803_v2 }
 0x326   :  { %v1413_v9 = vpack.i.bf16 %v518_v3, %v519_v6 }
 0x328   :  { %1414 = vrot.lane.b32.xlu2 %v1413_v9, %s1491_s9 }
 0x32b   :  { %v499_v61 = vpop.permute.xlu2 %498 }
 0x32c   :  { %v516_v20 = vmul.f32 %v499_v61, %v1778_v50  ;;  %v625_v50 = vpop.f32.mrf.mxu1 }
 0x334   :  { %v628_v36 = vpop.f32.mrf.mxu1 }
 0x335   :  { %v629_v37 = vadd.f32 1e-06, %v628_v36  ;;  %v1425_v36 = vld [vmem:[%s2181_s18] ss:$0 sm:$0xff] }
 0x343   :  { %v507_v14 = vpop.permute.xlu1 %506 }
 0x344   :  { %v520_v16 = vmul.f32 %v507_v14, %v1814_v8 }
 0x34b   :  { %v509_v15 = vpop.permute.xlu1 %508 }
 0x34c   :  { %v521_v18 = vmul.f32 %v509_v15, %v1821_v13 }
 0x34e   :  { %v1408_v19 = vpack.i.bf16 %v520_v16, %v521_v18 }
 0x350   :  { %1409 = vrot.lane.b32.xlu1 %v1408_v19, %s1491_s9 }
 0x353   :  { %v501_v2 = vpop.permute.xlu1 %500 }
 0x354   :  { %v517_v21 = vmul.f32 %v501_v2, %v1785_v56  ;;  %v626_v56 = vadd.f32 1e-06, %v625_v50  ;;  %v673_v50 = vld [vmem:[%s2223_s29 + $0x10] sm:$0xff] }
 0x356   :  { %v1418_v25 = vpack.i.bf16 %v516_v20, %v517_v21  ;;  %1449 = vrcp.f32 %v626_v56 }
 0x357   :  { %1451 = vrcp.f32 %v629_v37  ;;  %v672_v37 = vld [vmem:[%s2223_s29 + $0x8] sm:$0xff] }
 0x358   :  { %1419 = vrot.lane.b32.xlu1 %v1418_v25, %s1491_s9  ;;  %1453 = vrcp.f32 %v1493_v58 }
 0x35c   :  { %v1450_v38 = vpop.eup %1449 }
 0x382   :  { %v1415_v28 = vpop.permute.xlu2 %1414 }
 0x383   :  { %v1416_v8 = vunpack.i.l.bf16 %v1415_v28  ;;  %v1417_v13 = vunpack.i.h.bf16 %v1415_v28 }
 0x3c2   :  { %v1410_v26 = vpop.permute.xlu1 %1409 }
 0x3c3   :  { %v1411_v27 = vunpack.i.l.bf16 %v1410_v26  ;;  %v1412_v29 = vunpack.i.h.bf16 %v1410_v26 }
 0x3c5   :  { %595 = vmatpush.msra.mxu3 %v1411_v27 }
 0x3c7   :  { %596 = vmatpush.msra.mxu3 %v1412_v29 }
 0x3c9   :  { %597 = vmatpush.msra.mxu3 %v1416_v8 }
 0x3ca   :  { %v1420_v31 = vpop.permute.xlu1 %1419 }
 0x3cb   :  { %v1421_v33 = vunpack.i.l.bf16 %v1420_v31  ;;  %598 = vmatpush.msra.mxu3 %v1417_v13  ;;  %v1422_v34 = vunpack.i.h.bf16 %v1420_v31  ;;  %v674_v31 = vld [vmem:[%s2223_s29 + $0x18] sm:$0xff] }
 0x3cc   :  { %796 = vmatpush.msra.mxu1 %v674_v31 }
 0x3cd   :  { %599 = vmatpush.msra.mxu3 %v1421_v33 }
 0x3ce   :  { %797 = vmatpush.msra.mxu1 %v673_v50 }
 0x3cf   :  { %600 = vmatpush.msra.mxu3 %v1422_v34 }
 0x3d0   :  { %1327 = vmatmul.msk.f32.vlgmr.msra.gmra.mxu3 %vm578_vm3, %v538_v10  ;;  %798 = vmatpush.msra.mxu1 %v672_v37 }
 0x3d1   :  { %1331 = vmatpush.xpose.msk.msrb.mxu3 %vm426_vm2, %v1757_v41  ;;  %v1452_v41 = vpop.eup %1451 }
 0x3d2   :  { %v1454_v59 = vpop.eup %1453 }
 0x3d3   :  { %vm735_vm4 = vweird.f32 %v1454_v59 }
 0x3d5   :  { %1332 = vmatpush.xpose.msk.msrb.mxu3 %vm426_vm2, %v1763_v43  ;;  %v667_v43 = vld [vmem:[%s2221_s10 + $0x18] sm:$0xff] }
 0x3d6   :  { %708 = vmatpush.msra.mxu0 %v667_v43  ;;  %v671_v43 = vld [vmem:[%s2223_s29] sm:$0xff] }
 0x3d7   :  { %799 = vmatpush.msra.mxu1 %v671_v43 }
 0x3d8   :  { %1328 = vmatmul.msk.f32.gmra.mxu3 %vm578_vm3, %v539_v11  ;;  %709 = vmatpush.msra.mxu0 %v666_v39 }
 0x3d9   :  { %1333 = vmatpush.xpose.msk.msrb.mxu3 %vm426_vm2, %v1769_v44  ;;  %v665_v44 = vld [vmem:[%s2221_s10 + $0x8] sm:$0xff] }
 0x3da   :  { %710 = vmatpush.msra.mxu0 %v665_v44 }
 0x3dd   :  { %1334 = vmatpush.xpose.msk.msrb.mxu3 %vm426_vm2, %v1775_v45  ;;  %v664_v45 = vld [vmem:[%s2221_s10] sm:$0xff] }
 0x3de   :  { %711 = vmatpush.msra.mxu0 %v664_v45 }
 0x3e0   :  { %1335 = vmatmul.msk.f32.vlgmr.msrb.gmra.mxu3 %vm426_vm2, %v1450_v38  ;;  %931 = vmatpush.msrb.mxu0 %v896_v40 }
 0x3e2   :  { %932 = vmatpush.msrb.mxu0 %v895_v42 }
 0x3e4   :  { %933 = vmatpush.msrb.mxu0 %v894_v46 }
 0x3e6   :  { %934 = vmatpush.msrb.mxu0 %v893_v47 }
 0x3e8   :  { %1336 = vmatmul.msk.f32.gmra.mxu3 %vm426_vm2, %v1452_v41 }
 0x453   :  { %v602_v48 = vpop.f32.mrf.mxu3 }
 0x45b   :  { %v605_v49 = vpop.f32.mrf.mxu3 }
 0x463   :  { %v656_v51 = vpop.f32.mrf.mxu3 }
 0x464   :  { %v662_v52 = vmul.f32 %v656_v51, %v602_v48  ;;  %v1494_v48 = vmov 48.0  }
 0x465   :  { %1455 = vrcp.f32 %v1494_v48 }
 0x466   :  { %1337 = vmatmul.msk.f32.vlgmr.msra.gmra.mxu0 %vm101_vm0, %v662_v52 }
 0x46b   :  { %v659_v53 = vpop.f32.mrf.mxu3 }
 0x46c   :  { %v663_v55 = vmul.f32 %v659_v53, %v605_v49 }
 0x46e   :  { %1338 = vmatmul.msk.f32.gmra.mxu0 %vm101_vm0, %v663_v55 }
 0x476   :  { %1343 = vmatmul.msk.f32.vlgmr.msrb.gmra.mxu0 %vm101_vm0, %v1781_v54  ;;  %v1423_v54 = vld [vmem:[%s2222_s0] ss:$0 sm:$0xff]  ;;  %s2225_s0 = sld [smem:[#allocation15_spill]] }
 0x47e   :  { %1344 = vmatmul.msk.f32.gmra.mxu0 %vm101_vm0, %v1788_v60 }
 0x486   :  { %1345 = vmatmul.msk.f32.gmra.mxu0 %vm101_vm0, %v1799_v0 }
 0x48e   :  { %1346 = vmatmul.msk.f32.gmra.mxu0 %vm101_vm0, %v1810_v7  ;;  %v731_v7 = vmul.f32 16.0, %v1454_v59 }
 0x490   :  { %v732_v3 = vsub.f32 1.0, %v731_v7 }
 0x492   :  { %v733_v11 = vmul.f32 %v1454_v59, %v732_v3 }
 0x494   :  { %v734_v16 = vadd.f32 %v1454_v59, %v733_v11 }
 0x496   :  { %1347 = vmatmul.msk.f32.gmra.mxu0 %vm101_vm0, %v1817_v12  ;;  %v1902_v61 = vsel %vm735_vm4, %v1454_v59, %v734_v16  ;;  %v1456_v59 = vpop.eup %1455 }
 0x497   :  { %vm982_vm8 = vweird.f32 %v1456_v59 }
 0x49e   :  { %1348 = vmatmul.msk.f32.gmra.mxu0 %vm101_vm0, %v1824_v17 }
 0x4e3   :  { %v713_v57 = vpop.f32.mrf.mxu0 }
 0x4e4   :  { %v714_v60 = vadd.f32 %v1423_v54, %v713_v57 }
 0x4e6   :  { %v719_v0 = vadd.f32 %v714_v60, %v1663_v5 }
 0x4e8   :  { %v721_v12 = vsel %vm101_vm0, %v719_v0, 0.0 }
 0x4eb   :  { %v716_v62 = vpop.f32.mrf.mxu0 }
 0x4ec   :  { %v717_v63 = vadd.f32 %v1423_v54, %v716_v62 }
 0x4ee   :  { %v720_v1 = vadd.f32 %v717_v63, %v1658_v4 }
 0x4f0   :  { %v722_v17 = vsel %vm101_vm0, %v720_v1, 0.0 }
 0x4f1   :  { %v723_v6 = vadd.f32 %v722_v17, %v721_v12 }
 0x4f3   :  { %v724_v9 = vrot.slane %v723_v6, 4  ;;  %v936_v10 = vpop.f32.mrf.mxu0 }
 0x4f4   :  { %v937_v44 = vadd.f32 %v1425_v36, %v936_v10 }
 0x4f5   :  { %v725_v14 = vadd.f32 %v724_v9, %v723_v6 }
 0x4f6   :  { %v954_v51 = vadd.f32 %v937_v44, %v1699_v22 }
 0x4f7   :  { %v726_v15 = vrot.slane %v725_v14, 2 }
 0x4f8   :  { %v960_v54 = vsel %vm101_vm0, %v954_v51, 0.0 }
 0x4f9   :  { %v727_v18 = vadd.f32 %v726_v15, %v725_v14 }
 0x4fb   :  { %v728_v19 = vrot.slane %v727_v18, 1  ;;  %v939_v5 = vpop.f32.mrf.mxu0 }
 0x4fc   :  { %v940_v41 = vadd.f32 %v1425_v36, %v939_v5 }
 0x4fd   :  { %v729_v2 = vadd.f32 %v728_v19, %v727_v18 }
 0x4fe   :  { %v955_v42 = vadd.f32 %v940_v41, %v1707_v23 }
 0x4ff   :  { %v737_v4 = vmul.f32 %v1902_v61, %v729_v2 }
 0x500   :  { %v961_v57 = vsel %vm101_vm0, %v955_v42, 0.0 }
 0x501   :  { %v1905_v20 = vsub.f32 %v719_v0, %v737_v4  ;;  %v1907_v21 = vsub.f32 %v720_v1, %v737_v4  ;;  %v962_v62 = vadd.f32 %v961_v57, %v960_v54  ;;  %v978_v1 = vmul.f32 48.0, %v1456_v59 }
 0x503   :  { %v740_v25 = vmul.f32 %v1905_v20, %v1905_v20  ;;  %v741_v26 = vmul.f32 %v1907_v21, %v1907_v21  ;;  %v942_v27 = vpop.f32.mrf.mxu0  ;;  %v979_v10 = vsub.f32 1.0, %v978_v1 }
 0x504   :  { %v943_v45 = vadd.f32 %v1425_v36, %v942_v27 }
 0x505   :  { %v742_v28 = vsel %vm101_vm0, %v740_v25, 0.0  ;;  %v743_v29 = vsel %vm101_vm0, %v741_v26, 0.0  ;;  %v980_v16 = vmul.f32 %v1456_v59, %v979_v10 }
 0x506   :  { %v744_v8 = vadd.f32 %v743_v29, %v742_v28  ;;  %v956_v52 = vadd.f32 %v943_v45, %v1714_v24  ;;  %v1426_v28 = vld [vmem:[%s2225_s0] ss:$0 sm:$0xff]  ;;  %s2226_s0 = sld [smem:[#allocation17_spill]] }
 0x507   :  { %v981_v4 = vadd.f32 %v1456_v59, %v980_v16 }
 0x508   :  { %v745_v13 = vrot.slane %v744_v8, 4  ;;  %v963_v23 = vsel %vm101_vm0, %v956_v52, 0.0 }
 0x509   :  { %v964_v22 = vadd.f32 %v963_v23, %v962_v62 }
 0x50a   :  { %v746_v33 = vadd.f32 %v745_v13, %v744_v8  ;;  %v1950_v13 = vsel %vm982_vm8, %v1456_v59, %v981_v4  ;;  %v903_v59 = vld [vmem:[%s2184_s21 + $0x18] sm:$0xff] }
 0x50b   :  { %v945_v34 = vpop.f32.mrf.mxu0  ;;  %1083 = vmatpush.msrb.mxu1 %v903_v59  ;;  %v905_v59 = vld [vmem:[%s2186_s23] sm:$0xff] }
 0x50c   :  { %v747_v56 = vrot.slane %v746_v33, 2  ;;  %v946_v46 = vadd.f32 %v1425_v36, %v945_v34 }
 0x50e   :  { %v748_v38 = vadd.f32 %v747_v56, %v746_v33  ;;  %v957_v58 = vadd.f32 %v946_v46, %v1725_v30 }
 0x510   :  { %v749_v39 = vrot.slane %v748_v38, 1  ;;  %v965_v0 = vsel %vm101_vm0, %v957_v58, 0.0 }
 0x511   :  { %v966_v12 = vadd.f32 %v965_v0, %v964_v22  ;;  %v902_v0 = vld [vmem:[%s2184_s21 + $0x10] sm:$0xff]  ;;  %v901_v22 = vld [vmem:[%s2184_s21 + $0x8] sm:$0xff] }
 0x512   :  { %v750_v40 = vadd.f32 %v749_v39, %v748_v38  ;;  %1084 = vmatpush.msrb.mxu1 %v902_v0 }
 0x513   :  { %v948_v47 = vpop.f32.mrf.mxu0 }
 0x514   :  { %v751_v49 = vmul.f32 %v750_v40, %v1902_v61  ;;  %v949_v53 = vadd.f32 %v1425_v36, %v948_v47  ;;  %1085 = vmatpush.msrb.mxu1 %v901_v22 }
 0x516   :  { %v752_v55 = vadd.f32 1e-05, %v751_v49  ;;  %v958_v60 = vadd.f32 %v949_v53, %v1733_v32 }
 0x518   :  { %1457 = vrsqrt.f32 %v752_v55  ;;  %v967_v24 = vsel %vm101_vm0, %v958_v60, 0.0  ;;  %vm759_vm6 = vweird.f32 %v752_v55 }
 0x519   :  { %v968_v6 = vadd.f32 %v967_v24, %v966_v12  ;;  %v900_v24 = vld [vmem:[%s2184_s21] sm:$0xff] }
 0x51a   :  { %1086 = vmatpush.msrb.mxu1 %v900_v24 }
 0x51b   :  { %v951_v63 = vpop.f32.mrf.mxu0 }
 0x51c   :  { %v952_v7 = vadd.f32 %v1425_v36, %v951_v63 }
 0x51e   :  { %v1458_v17 = vpop.eup %1457  ;;  %v959_v30 = vadd.f32 %v952_v7, %v1743_v35  ;;  %v1424_v35 = vld [vmem:[%s2224_s6] ss:$0 sm:$0xff] }
 0x51f   :  { %v754_v3 = vmul.f32 %v1458_v17, %v752_v55  ;;  %vm760_vm5 = vweird.f32 %v1458_v17 }
 0x520   :  { %v969_v9 = vsel %vm101_vm0, %v959_v30, 0.0  ;;  %vm761_vm7 = vmor %vm759_vm6, %vm760_vm5 }
 0x521   :  { %v755_v32 = vmul.f32 %v1458_v17, %v754_v3  ;;  %v970_v11 = vadd.f32 %v969_v9, %v968_v6 }
 0x523   :  { %v756_v14 = vmul.f32 0.5, %v755_v32  ;;  %v971_v15 = vrot.slane %v970_v11, 4 }
 0x525   :  { %v757_v18 = vsub.f32 1.5, %v756_v14  ;;  %v972_v19 = vadd.f32 %v971_v15, %v970_v11  ;;  %v1427_v14 = vld [vmem:[%s2182_s19] ss:$0 sm:$0xff]  ;;  %s1267_s19 = sshll.u32 %s1495_s30, 4  ;;  %s1268_s19 = int_to_ptr.vmem [resolvable:$true] %s1267_s19 }
 0x527   :  { %v758_v5 = vmul.f32 %v1458_v17, %v757_v18  ;;  %v973_v2 = vrot.slane %v972_v19, 2  ;;  %v1428_v18 = vld [vmem:[%s2183_s20] ss:$0 sm:$0xff]  ;;  %s1269_s20 = sshll.u32 %s2190_s27, 4  ;;  %s1270_s20 = int_to_ptr.hbm [resolvable:$true] %s1269_s20 }
 0x529   :  { %v762_v25 = vsel %vm761_vm7, %v1458_v17, %v758_v5  ;;  %v974_v26 = vadd.f32 %v973_v2, %v972_v19 }
 0x52a   :  { %v763_v27 = vmul.f32 %v762_v25, %v1905_v20  ;;  %v764_v33 = vmul.f32 %v762_v25, %v1907_v21 }
 0x52b   :  { %v975_v29 = vrot.slane %v974_v26, 1 }
 0x52c   :  { %v768_v8 = vmul.f32 %v1424_v35, %v763_v27  ;;  %v769_v38 = vmul.f32 %v1424_v35, %v764_v33  ;;  %v682_v27 = vld [vmem:[%s2176_s13 + $0x30] sm:$0xff] }
 0x52d   :  { %v976_v31 = vadd.f32 %v975_v29, %v974_v26  ;;  %v683_v26 = vld [vmem:[%s2176_s13 + $0x38] sm:$0xff]  ;;  %v681_v29 = vld [vmem:[%s2176_s13 + $0x28] sm:$0xff] }
 0x52e   :  { %v1953_v34 = vadd.f32 %v1426_v28, %v768_v8  ;;  %827 = vmatpush.msra.mxu3 %v683_v26  ;;  %v680_v8 = vld [vmem:[%s2176_s13 + $0x20] sm:$0xff] }
 0x52f   :  { %v984_v50 = vmul.f32 %v1950_v13, %v976_v31 }
 0x530   :  { %1339 = vmatmul.msk.f32.vlgmr.msra.gmra.mxu1 %vm101_vm0, %v1953_v34  ;;  %828 = vmatpush.msra.mxu3 %v682_v27 }
 0x531   :  { %v985_v56 = vsub.f32 %v954_v51, %v984_v50  ;;  %v986_v20 = vsub.f32 %v955_v42, %v984_v50  ;;  %v987_v36 = vsub.f32 %v956_v52, %v984_v50  ;;  %v1958_v37 = vsub.f32 %v957_v58, %v984_v50 }
 0x532   :  { %v1960_v41 = vsub.f32 %v958_v60, %v984_v50  ;;  %v1962_v45 = vsub.f32 %v959_v30, %v984_v50  ;;  %v1968_v42 = vadd.f32 %v1426_v28, %v769_v38  ;;  %829 = vmatpush.msra.mxu3 %v681_v29  ;;  %v679_v50 = vld [vmem:[%s2176_s13 + $0x18] sm:$0xff] }
 0x533   :  { %v991_v43 = vmul.f32 %v985_v56, %v985_v56  ;;  %v992_v39 = vmul.f32 %v986_v20, %v986_v20  ;;  %v993_v44 = vmul.f32 %v987_v36, %v987_v36  ;;  %v994_v21 = vmul.f32 %v1958_v37, %v1958_v37 }
 0x534   :  { %v995_v48 = vmul.f32 %v1960_v41, %v1960_v41  ;;  %v996_v52 = vmul.f32 %v1962_v45, %v1962_v45  ;;  %830 = vmatpush.msra.mxu3 %v680_v8 }
 0x535   :  { %v997_v40 = vsel %vm101_vm0, %v991_v43, 0.0  ;;  %v998_v46 = vsel %vm101_vm0, %v992_v39, 0.0  ;;  %v1000_v49 = vsel %vm101_vm0, %v993_v44, 0.0  ;;  %v1002_v53 = vsel %vm101_vm0, %v994_v21, 0.0  ;;  %v678_v44 = vld [vmem:[%s2176_s13 + $0x10] sm:$0xff] }
 0x536   :  { %v999_v47 = vadd.f32 %v998_v46, %v997_v40  ;;  %v1004_v57 = vsel %vm101_vm0, %v995_v48, 0.0  ;;  %v1006_v54 = vsel %vm101_vm0, %v996_v52, 0.0  ;;  %831 = vmatpush.msra.mxu3 %v679_v50  ;;  %v912_v40 = vld [vmem:[%s2186_s23 + $0x38] sm:$0xff]  ;;  %v911_v46 = vld [vmem:[%s2186_s23 + $0x30] sm:$0xff]  ;;  %v909_v48 = vld [vmem:[%s2186_s23 + $0x20] sm:$0xff] }
 0x537   :  { %1141 = vmatpush.msrb.mxu2 %v912_v40 }
 0x538   :  { %v1001_v51 = vadd.f32 %v1000_v49, %v999_v47  ;;  %1340 = vmatmul.msk.f32.gmra.mxu1 %vm101_vm0, %v1968_v42  ;;  %832 = vmatpush.msra.mxu3 %v678_v44  ;;  %v910_v47 = vld [vmem:[%s2186_s23 + $0x28] sm:$0xff]  ;;  %v908_v49 = vld [vmem:[%s2186_s23 + $0x18] sm:$0xff] }
 0x539   :  { %1142 = vmatpush.msrb.mxu2 %v911_v46 }
 0x53a   :  { %v1003_v55 = vadd.f32 %v1002_v53, %v1001_v51  ;;  %v1429_v51 = vld [vmem:[%s2226_s0] ss:$0 sm:$0xff] }
 0x53b   :  { %1143 = vmatpush.msrb.mxu2 %v910_v47 }
 0x53c   :  { %v1005_v58 = vadd.f32 %v1004_v57, %v1003_v55 }
 0x53d   :  { %1144 = vmatpush.msrb.mxu2 %v909_v48 }
 0x53e   :  { %v1007_v23 = vadd.f32 %v1006_v54, %v1005_v58 }
 0x53f   :  { %1145 = vmatpush.msrb.mxu2 %v908_v49 }
 0x540   :  { %v1008_v60 = vrot.slane %v1007_v23, 4 }
 0x542   :  { %v1009_v62 = vadd.f32 %v1008_v60, %v1007_v23  ;;  %v907_v23 = vld [vmem:[%s2186_s23 + $0x10] sm:$0xff]  ;;  %v906_v60 = vld [vmem:[%s2186_s23 + $0x8] sm:$0xff] }
 0x543   :  { %1146 = vmatpush.msrb.mxu2 %v907_v23 }
 0x544   :  { %v1010_v63 = vrot.slane %v1009_v62, 2 }
 0x545   :  { %1147 = vmatpush.msrb.mxu2 %v906_v60 }
 0x546   :  { %v1011_v7 = vadd.f32 %v1010_v63, %v1009_v62  ;;  %v1430_v62 = vld [vmem:[%s2185_s22] ss:$0 sm:$0xff] }
 0x547   :  { %1148 = vmatpush.msrb.mxu2 %v905_v59 }
 0x548   :  { %v1012_v1 = vrot.slane %v1011_v7, 1 }
 0x54a   :  { %v1013_v12 = vadd.f32 %v1012_v1, %v1011_v7 }
 0x54c   :  { %v1014_v17 = vmul.f32 %v1013_v12, %v1950_v13 }
 0x54e   :  { %v1015_v30 = vadd.f32 1e-05, %v1014_v17 }
 0x550   :  { %1459 = vrsqrt.f32 %v1015_v30  ;;  %vm1022_vm10 = vweird.f32 %v1015_v30 }
 0x556   :  { %v1460_v3 = vpop.eup %1459 }
 0x557   :  { %v1017_v6 = vmul.f32 %v1460_v3, %v1015_v30  ;;  %vm1023_vm9 = vweird.f32 %v1460_v3 }
 0x558   :  { %vm1024_vm11 = vmor %vm1022_vm10, %vm1023_vm9 }
 0x559   :  { %v1018_v9 = vmul.f32 %v1460_v3, %v1017_v6 }
 0x55b   :  { %v1019_v10 = vmul.f32 0.5, %v1018_v9 }
 0x55d   :  { %v1020_v32 = vsub.f32 1.5, %v1019_v10 }
 0x55f   :  { %v1021_v11 = vmul.f32 %v1460_v3, %v1020_v32 }
 0x561   :  { %v1025_v15 = vsel %vm1024_vm11, %v1460_v3, %v1021_v11 }
 0x562   :  { %v1026_v16 = vmul.f32 %v1025_v15, %v985_v56  ;;  %v1027_v2 = vmul.f32 %v1025_v15, %v986_v20  ;;  %v1028_v25 = vmul.f32 %v1025_v15, %v987_v36  ;;  %v1029_v33 = vmul.f32 %v1025_v15, %v1958_v37 }
 0x563   :  { %v1030_v36 = vmul.f32 %v1025_v15, %v1960_v41  ;;  %v1031_v37 = vmul.f32 %v1025_v15, %v1962_v45  ;;  %v677_v41 = vld [vmem:[%s2176_s13 + $0x8] sm:$0xff]  ;;  %v676_v45 = vld [vmem:[%s2176_s13] sm:$0xff]  ;;  %s1497_s13 = smov 8  }
 0x564   :  { %v1035_v19 = vmul.f32 %v1427_v14, %v1026_v16  ;;  %v1036_v35 = vmul.f32 %v1427_v14, %v1027_v2  ;;  %v1037_v28 = vmul.f32 %v1427_v14, %v1028_v25  ;;  %v1038_v56 = vmul.f32 %v1427_v14, %v1029_v33  ;;  %833 = vmatpush.msra.mxu3 %v677_v41 }
 0x565   :  { %v1039_v38 = vmul.f32 %v1427_v14, %v1030_v36  ;;  %v1040_v39 = vmul.f32 %v1427_v14, %v1031_v37 }
 0x566   :  { %v1999_v5 = vadd.f32 %v1428_v18, %v1035_v19  ;;  %v2003_v4 = vadd.f32 %v1428_v18, %v1036_v35  ;;  %v2019_v31 = vadd.f32 %v1428_v18, %v1037_v28  ;;  %v2027_v20 = vadd.f32 %v1428_v18, %v1038_v56  ;;  %834 = vmatpush.msra.mxu3 %v676_v45  ;;  %v1431_v19 = vld [vmem:[%s2177_s14] ss:$0 sm:$0xff] }
 0x567   :  { %v2033_v43 = vadd.f32 %v1428_v18, %v1039_v38  ;;  %v2040_v21 = vadd.f32 %v1428_v18, %v1040_v39 }
 0x568   :  { %1349 = vmatmul.msk.f32.vlgmr.msrb.gmra.mxu1 %vm101_vm0, %v1999_v5 }
 0x570   :  { %1350 = vmatmul.msk.f32.gmra.mxu1 %vm101_vm0, %v2003_v4 }
 0x578   :  { %1351 = vmatmul.msk.f32.gmra.mxu1 %vm101_vm0, %v2019_v31 }
 0x580   :  { %1352 = vmatmul.msk.f32.gmra.mxu1 %vm101_vm0, %v2027_v20 }
 0x588   :  { %1353 = vmatmul.msk.f32.gmra.mxu1 %vm101_vm0, %v2033_v43 }
 0x590   :  { %1354 = vmatmul.msk.f32.gmra.mxu1 %vm101_vm0, %v2040_v21 }
 0x5ad   :  { %v801_v52 = vpop.f32.mrf.mxu1 }
 0x5ae   :  { %v802_v53 = vadd.f32 %v1429_v51, %v801_v52 }
 0x5b0   :  { %v807_v55 = vmax.f32 %v802_v53, 0.0 }
 0x5b2   :  { %1341 = vmatmul.msk.f32.vlgmr.msra.gmra.mxu3 %vm812_vm12, %v807_v55 }
 0x5b5   :  { %v804_v57 = vpop.f32.mrf.mxu1 }
 0x5b6   :  { %v805_v58 = vadd.f32 %v1429_v51, %v804_v57 }
 0x5b8   :  { %v808_v54 = vmax.f32 %v805_v58, 0.0 }
 0x5ba   :  { %1342 = vmatmul.msk.f32.gmra.mxu3 %vm812_vm12, %v808_v54 }
 0x5e5   :  { %v1088_v0 = vpop.f32.mrf.mxu1 }
 0x5e6   :  { %v1089_v22 = vadd.f32 %v1430_v62, %v1088_v0 }
 0x5e8   :  { %v1106_v63 = vmax.f32 %v1089_v22, 0.0 }
 0x5ea   :  { %1355 = vmatmul.msk.f32.vlgmr.msrb.gmra.mxu2 %vm812_vm12, %v1106_v63  ;;  %v1432_v63 = vld [vmem:[%s2178_s15] ss:$0 sm:$0xff]  ;;  %s1496_s15 = smov 128  }
 0x5ed   :  { %v1091_v24 = vpop.f32.mrf.mxu1 }
 0x5ee   :  { %v1092_v7 = vadd.f32 %v1430_v62, %v1091_v24 }
 0x5f0   :  { %v1107_v1 = vmax.f32 %v1092_v7, 0.0 }
 0x5f2   :  { %1356 = vmatmul.msk.f32.gmra.mxu2 %vm812_vm12, %v1107_v1  ;;  %v1433_v1 = vld [vmem:[%s2179_s16] ss:$0 sm:$0xff] }
 0x5f5   :  { %v1094_v12 = vpop.f32.mrf.mxu1 }
 0x5f6   :  { %v1095_v17 = vadd.f32 %v1430_v62, %v1094_v12 }
 0x5f8   :  { %v1108_v30 = vmax.f32 %v1095_v17, 0.0 }
 0x5fa   :  { %1357 = vmatmul.msk.f32.gmra.mxu2 %vm812_vm12, %v1108_v30 }
 0x5fd   :  { %v1097_v3 = vpop.f32.mrf.mxu1 }
 0x5fe   :  { %v1098_v6 = vadd.f32 %v1430_v62, %v1097_v3 }
 0x600   :  { %v1109_v9 = vmax.f32 %v1098_v6, 0.0 }
 0x602   :  { %1358 = vmatmul.msk.f32.gmra.mxu2 %vm812_vm12, %v1109_v9 }
 0x605   :  { %v1100_v10 = vpop.f32.mrf.mxu1 }
 0x606   :  { %v1101_v32 = vadd.f32 %v1430_v62, %v1100_v10  ;;  %v1434_v10 = vld [vmem:[%s2187_s24] ss:$0 sm:$0xff] }
 0x608   :  { %v1110_v11 = vmax.f32 %v1101_v32, 0.0 }
 0x60a   :  { %1359 = vmatmul.msk.f32.gmra.mxu2 %vm812_vm12, %v1110_v11 }
 0x60d   :  { %v1103_v14 = vpop.f32.mrf.mxu1 }
 0x60e   :  { %v1104_v15 = vadd.f32 %v1430_v62, %v1103_v14 }
 0x610   :  { %v1111_v16 = vmax.f32 %v1104_v15, 0.0 }
 0x612   :  { %1360 = vmatmul.msk.f32.gmra.mxu2 %vm812_vm12, %v1111_v16 }
 0x635   :  { %v836_v18 = vpop.f32.mrf.mxu3 }
 0x636   :  { %v837_v2 = vadd.f32 %v1431_v19, %v836_v18 }
 0x638   :  { %v842_v25 = vadd.f32 %v837_v2, %v1953_v34 }
 0x63a   :  { %v844_v28 = vsel %vm101_vm0, %v842_v25, 0.0 }
 0x63d   :  { %v839_v35 = vpop.f32.mrf.mxu3 }
 0x63e   :  { %v840_v26 = vadd.f32 %v1431_v19, %v839_v35 }
 0x640   :  { %v843_v27 = vadd.f32 %v840_v26, %v1968_v42 }
 0x642   :  { %v845_v29 = vsel %vm101_vm0, %v843_v27, 0.0 }
 0x643   :  { %v846_v8 = vadd.f32 %v845_v29, %v844_v28 }
 0x645   :  { %v847_v33 = vrot.slane %v846_v8, 4 }
 0x647   :  { %v848_v50 = vadd.f32 %v847_v33, %v846_v8 }
 0x649   :  { %v849_v56 = vrot.slane %v848_v50, 2 }
 0x64b   :  { %v850_v36 = vadd.f32 %v849_v56, %v848_v50 }
 0x64d   :  { %v851_v38 = vrot.slane %v850_v36, 1 }
 0x64f   :  { %v852_v37 = vadd.f32 %v851_v38, %v850_v36 }
 0x651   :  { %v853_v39 = vmul.f32 %v852_v37, %v1902_v61 }
 0x653   :  { %v854_v44 = vsub.f32 %v842_v25, %v853_v39  ;;  %v855_v41 = vsub.f32 %v843_v27, %v853_v39 }
 0x655   :  { %v856_v45 = vmul.f32 %v854_v44, %v854_v44  ;;  %v857_v34 = vmul.f32 %v855_v41, %v855_v41 }
 0x657   :  { %v858_v40 = vsel %vm101_vm0, %v856_v45, 0.0  ;;  %v859_v42 = vsel %vm101_vm0, %v857_v34, 0.0 }
 0x658   :  { %v860_v46 = vadd.f32 %v859_v42, %v858_v40 }
 0x65a   :  { %v861_v47 = vrot.slane %v860_v46, 4 }
 0x65c   :  { %v862_v48 = vadd.f32 %v861_v47, %v860_v46 }
 0x65e   :  { %v863_v49 = vrot.slane %v862_v48, 2 }
 0x660   :  { %v864_v51 = vadd.f32 %v863_v49, %v862_v48 }
 0x662   :  { %v865_v52 = vrot.slane %v864_v51, 1 }
 0x664   :  { %v866_v53 = vadd.f32 %v865_v52, %v864_v51 }
 0x666   :  { %v867_v55 = vmul.f32 %v866_v53, %v1902_v61 }
 0x668   :  { %v868_v57 = vadd.f32 1e-05, %v867_v55 }
 0x66a   :  { %1461 = vrsqrt.f32 %v868_v57  ;;  %vm875_vm14 = vweird.f32 %v868_v57 }
 0x66d   :  { %v1150_v58 = vpop.f32.mrf.mxu2 }
 0x66e   :  { %v1151_v11 = vadd.f32 %v1434_v10, %v1150_v58 }
 0x670   :  { %v1462_v54 = vpop.eup %1461  ;;  %v1168_v19 = vadd.f32 %v1151_v11, %v1999_v5 }
 0x671   :  { %v870_v23 = vmul.f32 %v1462_v54, %v868_v57  ;;  %vm876_vm13 = vweird.f32 %v1462_v54 }
 0x672   :  { %vm877_vm15 = vmor %vm875_vm14, %vm876_vm13  ;;  %v1174_v27 = vsel %vm101_vm0, %v1168_v19, 0.0 }
 0x673   :  { %v871_v60 = vmul.f32 %v1462_v54, %v870_v23 }
 0x675   :  { %v872_v59 = vmul.f32 0.5, %v871_v60  ;;  %v1153_v62 = vpop.f32.mrf.mxu2 }
 0x676   :  { %v1154_v32 = vadd.f32 %v1434_v10, %v1153_v62 }
 0x677   :  { %v873_v0 = vsub.f32 1.5, %v872_v59 }
 0x678   :  { %v1169_v15 = vadd.f32 %v1154_v32, %v2003_v4 }
 0x679   :  { %v874_v22 = vmul.f32 %v1462_v54, %v873_v0 }
 0x67a   :  { %v1175_v25 = vsel %vm101_vm0, %v1169_v15, 0.0 }
 0x67b   :  { %v878_v24 = vsel %vm877_vm15, %v1462_v54, %v874_v22  ;;  %v1176_v8 = vadd.f32 %v1175_v25, %v1174_v27  ;;  %v1436_v27 = vld [vmem:[%s2189_s26] ss:$0 sm:$0xff] }
 0x67c   :  { %v879_v7 = vmul.f32 %v878_v24, %v854_v44  ;;  %v880_v61 = vmul.f32 %v878_v24, %v855_v41 }
 0x67d   :  { %v1156_v12 = vpop.f32.mrf.mxu2 }
 0x67e   :  { %v884_v17 = vmul.f32 %v1432_v63, %v879_v7  ;;  %v885_v30 = vmul.f32 %v1432_v63, %v880_v61  ;;  %v1157_v14 = vadd.f32 %v1434_v10, %v1156_v12 }
 0x680   :  { %v889_v3 = vadd.f32 %v1433_v1, %v884_v17  ;;  %v890_v6 = vadd.f32 %v1433_v1, %v885_v30  ;;  %v1170_v2 = vadd.f32 %v1157_v14, %v2019_v31 }
 0x682   :  { %891 = vst.msk [vmem:[#allocation2] sm:$0xff] %vm101_vm0, %v889_v3  ;;  %v1177_v28 = vsel %vm101_vm0, %v1170_v2, 0.0 }
 0x683   :  { %892 = vst.msk [vmem:[#allocation2 + $0x8] sm:$0xff] %vm101_vm0, %v890_v6  ;;  %v1178_v33 = vadd.f32 %v1177_v28, %v1176_v8 }
 0x684   :  { %1275 = dma.vmem_to_hbm [thread:$0]  %s1268_s19, 256, %s1270_s20, [#allocation3], %s1496_s15, %s1496_s15, %s1497_s13  }
 0x685   :  { %v1159_v9 = vpop.f32.mrf.mxu2 }
 0x686   :  { %v1160_v16 = vadd.f32 %v1434_v10, %v1159_v9 }
 0x688   :  { %v1171_v26 = vadd.f32 %v1160_v16, %v2027_v20 }
 0x68a   :  { %v1179_v4 = vsel %vm101_vm0, %v1171_v26, 0.0 }
 0x68b   :  { %v1180_v31 = vadd.f32 %v1179_v4, %v1178_v33 }
 0x68d   :  { %v1162_v18 = vpop.f32.mrf.mxu2 }
 0x68e   :  { %v1163_v35 = vadd.f32 %v1434_v10, %v1162_v18 }
 0x690   :  { %v1172_v29 = vadd.f32 %v1163_v35, %v2033_v43 }
 0x692   :  { %v1181_v5 = vsel %vm101_vm0, %v1172_v29, 0.0 }
 0x693   :  { %v1182_v38 = vadd.f32 %v1181_v5, %v1180_v31 }
 0x695   :  { %v1165_v50 = vpop.f32.mrf.mxu2 }
 0x696   :  { %v1166_v56 = vadd.f32 %v1434_v10, %v1165_v50 }
 0x698   :  { %v1173_v36 = vadd.f32 %v1166_v56, %v2040_v21 }
 0x69a   :  { %v1183_v20 = vsel %vm101_vm0, %v1173_v36, 0.0 }
 0x69b   :  { %v1184_v37 = vadd.f32 %v1183_v20, %v1182_v38 }
 0x69d   :  { %v1185_v39 = vrot.slane %v1184_v37, 4 }
 0x69f   :  { %v1186_v44 = vadd.f32 %v1185_v39, %v1184_v37 }
 0x6a1   :  { %v1187_v41 = vrot.slane %v1186_v44, 2 }
 0x6a3   :  { %v1188_v45 = vadd.f32 %v1187_v41, %v1186_v44 }
 0x6a5   :  { %v1189_v43 = vrot.slane %v1188_v45, 1 }
 0x6a7   :  { %v1190_v34 = vadd.f32 %v1189_v43, %v1188_v45 }
 0x6a9   :  { %v1191_v40 = vmul.f32 %v1190_v34, %v1950_v13 }
 0x6ab   :  { %v1192_v42 = vsub.f32 %v1168_v19, %v1191_v40  ;;  %v1193_v46 = vsub.f32 %v1169_v15, %v1191_v40  ;;  %v1194_v47 = vsub.f32 %v1170_v2, %v1191_v40  ;;  %v1195_v48 = vsub.f32 %v1171_v26, %v1191_v40  ;;  %v1435_v19 = vld [vmem:[%s2188_s25] ss:$0 sm:$0xff] }
 0x6ac   :  { %v1196_v49 = vsub.f32 %v1172_v29, %v1191_v40  ;;  %v1197_v53 = vsub.f32 %v1173_v36, %v1191_v40 }
 0x6ad   :  { %v1198_v51 = vmul.f32 %v1192_v42, %v1192_v42  ;;  %v1199_v52 = vmul.f32 %v1193_v46, %v1193_v46  ;;  %v1200_v21 = vmul.f32 %v1194_v47, %v1194_v47  ;;  %v1201_v55 = vmul.f32 %v1195_v48, %v1195_v48 }
 0x6ae   :  { %v1202_v23 = vmul.f32 %v1196_v49, %v1196_v49  ;;  %v1203_v62 = vmul.f32 %v1197_v53, %v1197_v53 }
 0x6af   :  { %v1204_v57 = vsel %vm101_vm0, %v1198_v51, 0.0  ;;  %v1205_v58 = vsel %vm101_vm0, %v1199_v52, 0.0  ;;  %v1207_v60 = vsel %vm101_vm0, %v1200_v21, 0.0  ;;  %v1209_v0 = vsel %vm101_vm0, %v1201_v55, 0.0 }
 0x6b0   :  { %v1206_v54 = vadd.f32 %v1205_v58, %v1204_v57  ;;  %v1211_v63 = vsel %vm101_vm0, %v1202_v23, 0.0  ;;  %v1213_v7 = vsel %vm101_vm0, %v1203_v62, 0.0 }
 0x6b2   :  { %v1208_v59 = vadd.f32 %v1207_v60, %v1206_v54 }
 0x6b4   :  { %v1210_v22 = vadd.f32 %v1209_v0, %v1208_v59 }
 0x6b6   :  { %v1212_v24 = vadd.f32 %v1211_v63, %v1210_v22 }
 0x6b8   :  { %v1214_v61 = vadd.f32 %v1213_v7, %v1212_v24 }
 0x6ba   :  { %v1215_v1 = vrot.slane %v1214_v61, 4 }
 0x6bc   :  { %v1216_v12 = vadd.f32 %v1215_v1, %v1214_v61 }
 0x6be   :  { %v1217_v17 = vrot.slane %v1216_v12, 2 }
 0x6c0   :  { %v1218_v30 = vadd.f32 %v1217_v17, %v1216_v12 }
 0x6c2   :  { %v1219_v3 = vrot.slane %v1218_v30, 1 }
 0x6c4   :  { %v1220_v6 = vadd.f32 %v1219_v3, %v1218_v30 }
 0x6c6   :  { %v1221_v9 = vmul.f32 %v1220_v6, %v1950_v13 }
 0x6c8   :  { %v1222_v10 = vadd.f32 1e-05, %v1221_v9 }
 0x6ca   :  { %1463 = vrsqrt.f32 %v1222_v10  ;;  %vm1229_vm2 = vweird.f32 %v1222_v10 }
 0x6d0   :  { %v1464_v32 = vpop.eup %1463 }
 0x6d1   :  { %v1224_v11 = vmul.f32 %v1464_v32, %v1222_v10  ;;  %vm1230_vm1 = vweird.f32 %v1464_v32 }
 0x6d2   :  { %vm1231_vm3 = vmor %vm1229_vm2, %vm1230_vm1 }
 0x6d3   :  { %v1225_v14 = vmul.f32 %v1464_v32, %v1224_v11 }
 0x6d5   :  { %v1226_v15 = vmul.f32 0.5, %v1225_v14 }
 0x6d7   :  { %v1227_v16 = vsub.f32 1.5, %v1226_v15 }
 0x6d9   :  { %v1228_v18 = vmul.f32 %v1464_v32, %v1227_v16 }
 0x6db   :  { %v1232_v2 = vsel %vm1231_vm3, %v1464_v32, %v1228_v18 }
 0x6dc   :  { %v1233_v35 = vmul.f32 %v1232_v2, %v1192_v42  ;;  %v1234_v25 = vmul.f32 %v1232_v2, %v1193_v46  ;;  %v1235_v26 = vmul.f32 %v1232_v2, %v1194_v47  ;;  %v1236_v13 = vmul.f32 %v1232_v2, %v1195_v48 }
 0x6dd   :  { %v1237_v28 = vmul.f32 %v1232_v2, %v1196_v49  ;;  %v1238_v29 = vmul.f32 %v1232_v2, %v1197_v53 }
 0x6de   :  { %v1242_v8 = vmul.f32 %v1435_v19, %v1233_v35  ;;  %v1243_v4 = vmul.f32 %v1435_v19, %v1234_v25  ;;  %v1244_v33 = vmul.f32 %v1435_v19, %v1235_v26  ;;  %v1245_v50 = vmul.f32 %v1435_v19, %v1236_v13 }
 0x6df   :  { %v1246_v5 = vmul.f32 %v1435_v19, %v1237_v28  ;;  %v1247_v56 = vmul.f32 %v1435_v19, %v1238_v29 }
 0x6e0   :  { %v1251_v31 = vadd.f32 %v1436_v27, %v1242_v8  ;;  %v1252_v36 = vadd.f32 %v1436_v27, %v1243_v4  ;;  %v1253_v38 = vadd.f32 %v1436_v27, %v1244_v33  ;;  %v1254_v20 = vadd.f32 %v1436_v27, %v1245_v50 }
 0x6e1   :  { %v1255_v37 = vadd.f32 %v1436_v27, %v1246_v5  ;;  %v1256_v39 = vadd.f32 %v1436_v27, %v1247_v56 }
 0x6e2   :  { %1257 = vst.msk [vmem:[%s2191_s28] sm:$0xff] %vm101_vm0, %v1251_v31 }
 0x6e3   :  { %1258 = vst.msk [vmem:[%s2191_s28 + $0x8] sm:$0xff] %vm101_vm0, %v1252_v36 }
 0x6e4   :  { %1259 = vst.msk [vmem:[%s2191_s28 + $0x10] sm:$0xff] %vm101_vm0, %v1253_v38 }
 0x6e5   :  { %1260 = vst.msk [vmem:[%s2191_s28 + $0x18] sm:$0xff] %vm101_vm0, %v1254_v20 }
 0x6e6   :  { %1261 = vst.msk [vmem:[%s2191_s28 + $0x20] sm:$0xff] %vm101_vm0, %v1255_v37 }
 0x6e7   :  { %1262 = vst.msk [vmem:[%s2191_s28 + $0x28] sm:$0xff] %vm101_vm0, %v1256_v39 }
 0x6e8   :  { %1489 = dma.done.wait [#allocation3], 256  }
 0x6e9   :  { %1490 = vsyncadd [#allocation3], 4294967040 }
 0x6ea   :  { %1284 = vsyncpa [#allocation3], 1 }

</bundles_post_ra>
